<compile_context>
chip_gen: v5e
topology: v5e:2x2
jax: 0.10.0
libtpu: 0.0.40
codegen_flags: <defaults>
</compile_context>

<pallas_src>
import math
import functools

import jax
import jax.numpy as jnp
from jax import lax
from jax.experimental import pallas as pl
from jax.experimental.pallas import tpu as pltpu


# ----------------------------------------------------------------------------
# Fused forward kernel (single invocation, no grid, everything in VMEM)
# ----------------------------------------------------------------------------
def _fused_forward_kernel(
    # inputs
    x_ref, head_mask_ref, seg_ones_ref, causal_ref,
    wq_ref, wk_ref, wv_ref, bq_ref, bk_ref, bv_ref,
    wo_ref, bo_ref, ln1_g_ref, ln1_b_ref,
    w1_ref, b1_ref, w2_ref, b2_ref, ln2_g_ref, ln2_b_ref,
    lnf_g_ref, lnf_b_ref, out_w_ref, out_b_ref,
    # outputs
    logits_ref, attnw_ref,
    *, num_layers, batch, seq_len, num_heads, head_dim, eps):
  S = seq_len
  scale = 1.0 / math.sqrt(head_dim)

  def mm(a, w):
    # bf16 MXU inputs, f32 accumulation (projection / FFN / vocab matmuls)
    return jnp.dot(a.astype(jnp.bfloat16), w.astype(jnp.bfloat16),
                   preferred_element_type=jnp.float32)

  def layer_norm(y, g, b):
    mu = jnp.mean(y, axis=-1, keepdims=True)
    var = jnp.mean((y - mu) ** 2, axis=-1, keepdims=True)
    return (y - mu) * lax.rsqrt(var + eps) * g + b

  head_mask = head_mask_ref[...]        # [nh*S, H]    block-diag head selector
  seg_ones = seg_ones_ref[...]          # [nh*S, nh*S] per-head segment summer
  causal = causal_ref[...] > 0.5        # [S, nh*S]    causal mask (heads packed on lanes)

  x = x_ref[...]                        # [B*S, D] f32 (embeddings + positional enc.)

  for l in range(num_layers):           # static unroll; weights indexed per layer
    # ---- causal multi-head self-attention ---------------------------------
    q = mm(x, wq_ref[l]) + bq_ref[l]    # [B*S, H]
    k = mm(x, wk_ref[l]) + bk_ref[l]
    v = mm(x, wv_ref[l]) + bv_ref[l]

    outs = []
    for b in range(batch):              # static unroll over batch (B=2)
      qb = q[b * S:(b + 1) * S, :]      # [S, H]   (sublane-aligned row slices)
      kb = k[b * S:(b + 1) * S, :]
      vb = v[b * S:(b + 1) * S, :]
      # block-diagonal expansion: all heads handled by one lane-packed matmul
      k_bd = jnp.concatenate([kb] * num_heads, axis=0) * head_mask    # [nh*S, H]
      v_bd = jnp.concatenate([vb] * num_heads, axis=0) * head_mask
      # scores for all heads: s[i, h*S + j] = <q_h[i], k_h[j]> * scale
      s = lax.dot_general(qb, k_bd, (((1,), (1,)), ((), ())),
                          preferred_element_type=jnp.float32) * scale  # [S, nh*S]
      s = jnp.where(causal, s, jnp.float32(-1e30))
      m = jnp.max(s, axis=-1, keepdims=True)   # per-row max (same const per segment is valid)
      e = jnp.exp(s - m)                       # masked entries underflow to exactly 0
      denom = jnp.dot(e, seg_ones, preferred_element_type=jnp.float32)  # per-head sums
      p = e / denom                            # exact softmax (review correctness fix)
      attnw_ref[l, b, :, :] = p                # one lane-packed [S, nh*S] store
      outs.append(jnp.dot(p, v_bd, preferred_element_type=jnp.float32))  # [S, H]
    attn_out = jnp.concatenate(outs, axis=0)   # [B*S, H]

    # ---- output projection + residual + LayerNorm (post-LN block) ---------
    # (dropout p=0.2 is identity in eval mode)
    x = layer_norm(mm(attn_out, wo_ref[l]) + bo_ref[l] + x,
                   ln1_g_ref[l], ln1_b_ref[l])

    # ---- FFN (Linear+ReLU, Linear) + residual + LayerNorm ------------------
    h = jnp.maximum(mm(x, w1_ref[l]) + b1_ref[l], 0.0)
    x = layer_norm(mm(h, w2_ref[l]) + b2_ref[l] + x,
                   ln2_g_ref[l], ln2_b_ref[l])

  # ---- final LayerNorm + vocab projection (final dropout = identity) -------
  xf = layer_norm(x, lnf_g_ref[...], lnf_b_ref[...])
  logits_ref[...] = mm(xf, out_w_ref[...]) + out_b_ref[...]


# ----------------------------------------------------------------------------
# Host-side helpers
# ----------------------------------------------------------------------------
def _attention_masks(seq_len, num_heads, head_dim):
  """Constant masks for the block-diagonal multi-head attention (built in XLA)."""
  S, nh, dh = seq_len, num_heads, head_dim
  NS, H = nh * S, nh * dh
  r = jnp.arange(NS)[:, None]
  head_mask = (r // S == jnp.arange(H)[None, :] // dh).astype(jnp.float32)   # [NS, H]
  seg_ones = (r // S == jnp.arange(NS)[None, :] // S).astype(jnp.float32)    # [NS, NS]
  causal = ((jnp.arange(NS)[None, :] % S)
            <= jnp.arange(S)[:, None]).astype(jnp.float32)                   # [S, NS]
  return head_mask, seg_ones, causal


def sinusoidal_pe(seq_len, embed_dim):
  pos = jnp.arange(seq_len, dtype=jnp.float32)[:, None]
  i = jnp.arange(0, embed_dim, 2, dtype=jnp.float32)[None, :]
  angle = pos / jnp.power(10000.0, i / embed_dim)
  pe = jnp.zeros((seq_len, embed_dim), jnp.float32)
  pe = pe.at[:, 0::2].set(jnp.sin(angle))
  pe = pe.at[:, 1::2].set(jnp.cos(angle))
  return pe


def init_params(key, vocab_size, embed_dim, seq_len, hidden_dim, num_heads,
                dec_ffn_h_dim, num_dec):
  D, H, F, V, L = embed_dim, hidden_dim, dec_ffn_h_dim, vocab_size, num_dec
  keys = iter(jax.random.split(key, 16))

  def wf32(shape):
    return jax.random.normal(next(keys), shape, jnp.float32) * 0.02

  def wbf16(shape):
    # matmul weights stored bf16 (MXU-native, half the HBM traffic)
    return wf32(shape).astype(jnp.bfloat16)

  return {
      "embed": wf32((V, D)),
      "pe": sinusoidal_pe(seq_len, D),          # hoisted out of the forward
      "wq": wbf16((L, D, H)), "wk": wbf16((L, D, H)), "wv": wbf16((L, D, H)),
      "bq": wf32((L, 1, H)), "bk": wf32((L, 1, H)), "bv": wf32((L, 1, H)),
      "wo": wbf16((L, H, D)), "bo": wf32((L, 1, D)),
      "ln1_g": jnp.ones((L, 1, D), jnp.float32),
      "ln1_b": jnp.zeros((L, 1, D), jnp.float32),
      "w1": wbf16((L, D, F)), "b1": wf32((L, 1, F)),
      "w2": wbf16((L, F, D)), "b2": wf32((L, 1, D)),
      "ln2_g": jnp.ones((L, 1, D), jnp.float32),
      "ln2_b": jnp.zeros((L, 1, D), jnp.float32),
      "lnf_g": jnp.ones((1, D), jnp.float32),
      "lnf_b": jnp.zeros((1, D), jnp.float32),
      "out_w": wbf16((D, V)), "out_b": wf32((1, V)),
  }


def decoder_only_transformer(params, tokens, *, num_heads):
  """tokens: [B, S] int32 -> (logits [B, S, V], [attn_w [B, nh, S, S] per layer])."""
  B, S = tokens.shape
  L, D, H = params["wq"].shape
  V = params["out_w"].shape[1]
  dh = H // num_heads

  # TODO(synk): embedding gather + PE add stay in XLA; an in-kernel
  # scalar-prefetch gather buys nothing at vocab=64 / B*S=16.
  x = params["embed"][tokens] + params["pe"][None, :S, :]
  x = x.reshape(B * S, D)

  head_mask, seg_ones, causal = _attention_masks(S, num_heads, dh)

  kernel = functools.partial(
      _fused_forward_kernel, num_layers=L, batch=B, seq_len=S,
      num_heads=num_heads, head_dim=dh, eps=1e-5)

  operands = (
      x, head_mask, seg_ones, causal,
      params["wq"], params["wk"], params["wv"],
      params["bq"], params["bk"], params["bv"],
      params["wo"], params["bo"], params["ln1_g"], params["ln1_b"],
      params["w1"], params["b1"], params["w2"], params["b2"],
      params["ln2_g"], params["ln2_b"],
      params["lnf_g"], params["lnf_b"], params["out_w"], params["out_b"],
  )

  # Whole-array VMEM blocks, no grid: one launch, activations never leave VMEM.
  vmem = lambda: pl.BlockSpec(memory_space=pltpu.MemorySpace.VMEM)
  logits2, attnw = pl.pallas_call(
      kernel,
      out_shape=(
          jax.ShapeDtypeStruct((B * S, V), jnp.float32),
          jax.ShapeDtypeStruct((L, B, S, num_heads * S), jnp.float32),
      ),
      in_specs=[vmem() for _ in operands],
      out_specs=(vmem(), vmem()),
  )(*operands)

  logits = logits2.reshape(B, S, V)
  # lane-packed [S, nh*S] kernel layout -> PyTorch's [B, nh, S, S]
  aw = attnw.reshape(L, B, S, num_heads, S).transpose(0, 1, 3, 2, 4)
  attention_weights = [aw[i] for i in range(L)]
  return logits, attention_weights


# ----------------------------------------------------------------------------
if __name__ == "__main__":
  vocab_size = 64
  embed_dim = 32
  seq_len = 8
  hidden_dim = 32
  num_heads = 4
  dec_ffn_h_dim = 64
  num_dec = 2
  batch = 2

  key = jax.random.PRNGKey(0)
  pkey, tkey = jax.random.split(key)
  params = init_params(pkey, vocab_size, embed_dim, seq_len, hidden_dim,
                       num_heads, dec_ffn_h_dim, num_dec)
  tokens = jax.random.randint(tkey, (batch, seq_len), 0, vocab_size,
                              dtype=jnp.int32)

  forward = jax.jit(functools.partial(decoder_only_transformer,
                                      num_heads=num_heads))
  logits, attn_ws = forward(params, tokens)
  logits = jax.block_until_ready(logits)
  attn_ws = [jax.block_until_ready(w) for w in attn_ws]

  assert logits.shape == (batch, seq_len, vocab_size)
  assert len(attn_ws) == num_dec
  assert all(w.shape == (batch, num_heads, seq_len, seq_len) for w in attn_ws)
  # exact softmax: every attention row sums to 1
  for w in attn_ws:
    assert bool(jnp.allclose(jnp.sum(w, axis=-1), 1.0, atol=1e-4))
  # causality: strictly-upper-triangular weights are exactly zero
  tri = jnp.triu(jnp.ones((seq_len, seq_len)), k=1).astype(bool)
  assert bool(jnp.all(jnp.abs(jnp.where(tri, attn_ws[0], 0.0)) < 1e-6))
  assert bool(jnp.all(jnp.isfinite(logits)))
  print("KERNEL_OK")
</pallas_src>

<mosaic_0001>
module attributes {stable_mosaic.version = 11 : i64} {
  func.func @_fused_forward_kernel(%arg0: memref<16x32xf32, #tpu.memory_space<vmem>>, %arg1: memref<32x32xf32, #tpu.memory_space<vmem>>, %arg2: memref<32x32xf32, #tpu.memory_space<vmem>>, %arg3: memref<8x32xf32, #tpu.memory_space<vmem>>, %arg4: memref<2x32x32xbf16, #tpu.memory_space<vmem>>, %arg5: memref<2x32x32xbf16, #tpu.memory_space<vmem>>, %arg6: memref<2x32x32xbf16, #tpu.memory_space<vmem>>, %arg7: memref<2x1x32xf32, #tpu.memory_space<vmem>>, %arg8: memref<2x1x32xf32, #tpu.memory_space<vmem>>, %arg9: memref<2x1x32xf32, #tpu.memory_space<vmem>>, %arg10: memref<2x32x32xbf16, #tpu.memory_space<vmem>>, %arg11: memref<2x1x32xf32, #tpu.memory_space<vmem>>, %arg12: memref<2x1x32xf32, #tpu.memory_space<vmem>>, %arg13: memref<2x1x32xf32, #tpu.memory_space<vmem>>, %arg14: memref<2x32x64xbf16, #tpu.memory_space<vmem>>, %arg15: memref<2x1x64xf32, #tpu.memory_space<vmem>>, %arg16: memref<2x64x32xbf16, #tpu.memory_space<vmem>>, %arg17: memref<2x1x32xf32, #tpu.memory_space<vmem>>, %arg18: memref<2x1x32xf32, #tpu.memory_space<vmem>>, %arg19: memref<2x1x32xf32, #tpu.memory_space<vmem>>, %arg20: memref<1x32xf32, #tpu.memory_space<vmem>>, %arg21: memref<1x32xf32, #tpu.memory_space<vmem>>, %arg22: memref<32x64xbf16, #tpu.memory_space<vmem>>, %arg23: memref<1x64xf32, #tpu.memory_space<vmem>>, %arg24: memref<16x64xf32, #tpu.memory_space<vmem>>, %arg25: memref<2x2x8x32xf32, #tpu.memory_space<vmem>>) attributes {dimension_semantics = [], scalar_prefetch = 0 : i64, scratch_operands = 0 : i64, tpu.core_type = #tpu.core_type<tc>} {
    %c0 = arith.constant 0 : index
    %c0_0 = arith.constant 0 : index
    %0 = vector.load %arg1[%c0, %c0_0] : memref<32x32xf32, #tpu.memory_space<vmem>>, vector<32x32xf32>
    %c0_1 = arith.constant 0 : index
    %c0_2 = arith.constant 0 : index
    %1 = vector.load %arg2[%c0_1, %c0_2] : memref<32x32xf32, #tpu.memory_space<vmem>>, vector<32x32xf32>
    %c0_3 = arith.constant 0 : index
    %c0_4 = arith.constant 0 : index
    %2 = vector.load %arg3[%c0_3, %c0_4] : memref<8x32xf32, #tpu.memory_space<vmem>>, vector<8x32xf32>
    %cst = arith.constant 5.000000e-01 : f32
    %3 = vector.broadcast %cst : f32 to vector<8x32xf32>
    %4 = arith.cmpf ogt, %2, %3 : vector<8x32xf32>
    %c0_5 = arith.constant 0 : index
    %c0_6 = arith.constant 0 : index
    %5 = vector.load %arg0[%c0_5, %c0_6] : memref<16x32xf32, #tpu.memory_space<vmem>>, vector<16x32xf32>
    %c0_7 = arith.constant 0 : index
    %c0_8 = arith.constant 0 : index
    %c0_9 = arith.constant 0 : index
    %6 = vector.load %arg4[%c0_7, %c0_8, %c0_9] : memref<2x32x32xbf16, #tpu.memory_space<vmem>>, vector<1x32x32xbf16>
    %7 = vector.shape_cast %6 : vector<1x32x32xbf16> to vector<32x32xbf16>
    %8 = arith.truncf %5 : vector<16x32xf32> to vector<16x32xbf16>
    %cst_10 = arith.constant dense<0.000000e+00> : vector<16x32xf32>
    %9 = tpu.matmul %8, %7, %cst_10 {dimension_numbers = #tpu.dot_dimension_numbers<[1], [0], [0], [1], [0, 0, 1, 1], [], []>} : vector<16x32xbf16>, vector<32x32xbf16>, vector<16x32xf32> -> vector<16x32xf32>
    %c0_11 = arith.constant 0 : index
    %c0_12 = arith.constant 0 : index
    %c0_13 = arith.constant 0 : index
    %10 = vector.load %arg7[%c0_11, %c0_12, %c0_13] : memref<2x1x32xf32, #tpu.memory_space<vmem>>, vector<1x1x32xf32>
    %11 = vector.shape_cast %10 : vector<1x1x32xf32> to vector<1x32xf32>
    %12 = vector.broadcast %11 : vector<1x32xf32> to vector<16x32xf32>
    %13 = arith.addf %9, %12 : vector<16x32xf32>
    %c0_14 = arith.constant 0 : index
    %c0_15 = arith.constant 0 : index
    %c0_16 = arith.constant 0 : index
    %14 = vector.load %arg5[%c0_14, %c0_15, %c0_16] : memref<2x32x32xbf16, #tpu.memory_space<vmem>>, vector<1x32x32xbf16>
    %15 = vector.shape_cast %14 : vector<1x32x32xbf16> to vector<32x32xbf16>
    %16 = arith.truncf %5 : vector<16x32xf32> to vector<16x32xbf16>
    %cst_17 = arith.constant dense<0.000000e+00> : vector<16x32xf32>
    %17 = tpu.matmul %16, %15, %cst_17 {dimension_numbers = #tpu.dot_dimension_numbers<[1], [0], [0], [1], [0, 0, 1, 1], [], []>} : vector<16x32xbf16>, vector<32x32xbf16>, vector<16x32xf32> -> vector<16x32xf32>
    %c0_18 = arith.constant 0 : index
    %c0_19 = arith.constant 0 : index
    %c0_20 = arith.constant 0 : index
    %18 = vector.load %arg8[%c0_18, %c0_19, %c0_20] : memref<2x1x32xf32, #tpu.memory_space<vmem>>, vector<1x1x32xf32>
    %19 = vector.shape_cast %18 : vector<1x1x32xf32> to vector<1x32xf32>
    %20 = vector.broadcast %19 : vector<1x32xf32> to vector<16x32xf32>
    %21 = arith.addf %17, %20 : vector<16x32xf32>
    %c0_21 = arith.constant 0 : index
    %c0_22 = arith.constant 0 : index
    %c0_23 = arith.constant 0 : index
    %22 = vector.load %arg6[%c0_21, %c0_22, %c0_23] : memref<2x32x32xbf16, #tpu.memory_space<vmem>>, vector<1x32x32xbf16>
    %23 = vector.shape_cast %22 : vector<1x32x32xbf16> to vector<32x32xbf16>
    %24 = arith.truncf %5 : vector<16x32xf32> to vector<16x32xbf16>
    %cst_24 = arith.constant dense<0.000000e+00> : vector<16x32xf32>
    %25 = tpu.matmul %24, %23, %cst_24 {dimension_numbers = #tpu.dot_dimension_numbers<[1], [0], [0], [1], [0, 0, 1, 1], [], []>} : vector<16x32xbf16>, vector<32x32xbf16>, vector<16x32xf32> -> vector<16x32xf32>
    %c0_25 = arith.constant 0 : index
    %c0_26 = arith.constant 0 : index
    %c0_27 = arith.constant 0 : index
    %26 = vector.load %arg9[%c0_25, %c0_26, %c0_27] : memref<2x1x32xf32, #tpu.memory_space<vmem>>, vector<1x1x32xf32>
    %27 = vector.shape_cast %26 : vector<1x1x32xf32> to vector<1x32xf32>
    %28 = vector.broadcast %27 : vector<1x32xf32> to vector<16x32xf32>
    %29 = arith.addf %25, %28 : vector<16x32xf32>
    %30 = vector.extract_strided_slice %13 {offsets = [0, 0], sizes = [8, 32], strides = [1, 1]} : vector<16x32xf32> to vector<8x32xf32>
    %31 = vector.extract_strided_slice %21 {offsets = [0, 0], sizes = [8, 32], strides = [1, 1]} : vector<16x32xf32> to vector<8x32xf32>
    %32 = vector.extract_strided_slice %29 {offsets = [0, 0], sizes = [8, 32], strides = [1, 1]} : vector<16x32xf32> to vector<8x32xf32>
    %33 = tpu.concatenate %31, %31, %31, %31 in 0 : vector<8x32xf32>, vector<8x32xf32>, vector<8x32xf32>, vector<8x32xf32> -> vector<32x32xf32>
    %34 = arith.mulf %33, %0 : vector<32x32xf32>
    %35 = tpu.concatenate %32, %32, %32, %32 in 0 : vector<8x32xf32>, vector<8x32xf32>, vector<8x32xf32>, vector<8x32xf32> -> vector<32x32xf32>
    %36 = arith.mulf %35, %0 : vector<32x32xf32>
    %cst_28 = arith.constant dense<0.000000e+00> : vector<8x32xf32>
    %37 = tpu.matmul %30, %34, %cst_28 {dimension_numbers = #tpu.dot_dimension_numbers<[1], [1], [0], [0], [0, 0, 1, 0], [], []>} : vector<8x32xf32>, vector<32x32xf32>, vector<8x32xf32> -> vector<8x32xf32>
    %cst_29 = arith.constant 0.353553385 : f32
    %38 = vector.broadcast %cst_29 : f32 to vector<8x32xf32>
    %39 = arith.mulf %37, %38 : vector<8x32xf32>
    %cst_30 = arith.constant -1.000000e+30 : f32
    %40 = vector.broadcast %cst_30 : f32 to vector<8x32xf32>
    %41 = arith.select %4, %39, %40 : vector<8x32xi1>, vector<8x32xf32>
    %cst_31 = arith.constant dense<0xFF800000> : vector<8xf32>
    %42 = vector.multi_reduction <maximumf>, %41, %cst_31 [1] : vector<8x32xf32> to vector<8xf32>
    %43 = vector.shape_cast %42 : vector<8xf32> to vector<8x1xf32>
    %44 = vector.broadcast %43 : vector<8x1xf32> to vector<8x32xf32>
    %45 = arith.subf %41, %44 : vector<8x32xf32>
    %46 = math.exp %45 : vector<8x32xf32>
    %cst_32 = arith.constant dense<0.000000e+00> : vector<8x32xf32>
    %47 = tpu.matmul %46, %1, %cst_32 {dimension_numbers = #tpu.dot_dimension_numbers<[1], [0], [0], [1], [0, 0, 1, 1], [], []>} : vector<8x32xf32>, vector<32x32xf32>, vector<8x32xf32> -> vector<8x32xf32>
    %48 = arith.divf %46, %47 : vector<8x32xf32>
    %c0_33 = arith.constant 0 : index
    %c0_34 = arith.constant 0 : index
    %c0_35 = arith.constant 0 : index
    %c0_36 = arith.constant 0 : index
    %49 = vector.load %arg25[%c0_33, %c0_34, %c0_35, %c0_36] : memref<2x2x8x32xf32, #tpu.memory_space<vmem>>, vector<1x1x8x32xf32>
    %50 = vector.shape_cast %49 : vector<1x1x8x32xf32> to vector<8x32xf32>
    %51 = vector.shape_cast %48 : vector<8x32xf32> to vector<1x1x8x32xf32>
    tpu.vector_store %arg25[%c0_33, %c0_34, %c0_35, %c0_36], %51 {strides = array<i32>} : memref<2x2x8x32xf32, #tpu.memory_space<vmem>>, vector<1x1x8x32xf32>,
    %cst_37 = arith.constant dense<0.000000e+00> : vector<8x32xf32>
    %52 = tpu.matmul %48, %36, %cst_37 {dimension_numbers = #tpu.dot_dimension_numbers<[1], [0], [0], [1], [0, 0, 1, 1], [], []>} : vector<8x32xf32>, vector<32x32xf32>, vector<8x32xf32> -> vector<8x32xf32>
    %53 = vector.extract_strided_slice %13 {offsets = [8, 0], sizes = [8, 32], strides = [1, 1]} : vector<16x32xf32> to vector<8x32xf32>
    %54 = vector.extract_strided_slice %21 {offsets = [8, 0], sizes = [8, 32], strides = [1, 1]} : vector<16x32xf32> to vector<8x32xf32>
    %55 = vector.extract_strided_slice %29 {offsets = [8, 0], sizes = [8, 32], strides = [1, 1]} : vector<16x32xf32> to vector<8x32xf32>
    %56 = tpu.concatenate %54, %54, %54, %54 in 0 : vector<8x32xf32>, vector<8x32xf32>, vector<8x32xf32>, vector<8x32xf32> -> vector<32x32xf32>
    %57 = arith.mulf %56, %0 : vector<32x32xf32>
    %58 = tpu.concatenate %55, %55, %55, %55 in 0 : vector<8x32xf32>, vector<8x32xf32>, vector<8x32xf32>, vector<8x32xf32> -> vector<32x32xf32>
    %59 = arith.mulf %58, %0 : vector<32x32xf32>
    %cst_38 = arith.constant dense<0.000000e+00> : vector<8x32xf32>
    %60 = tpu.matmul %53, %57, %cst_38 {dimension_numbers = #tpu.dot_dimension_numbers<[1], [1], [0], [0], [0, 0, 1, 0], [], []>} : vector<8x32xf32>, vector<32x32xf32>, vector<8x32xf32> -> vector<8x32xf32>
    %cst_39 = arith.constant 0.353553385 : f32
    %61 = vector.broadcast %cst_39 : f32 to vector<8x32xf32>
    %62 = arith.mulf %60, %61 : vector<8x32xf32>
    %cst_40 = arith.constant -1.000000e+30 : f32
    %63 = vector.broadcast %cst_40 : f32 to vector<8x32xf32>
    %64 = arith.select %4, %62, %63 : vector<8x32xi1>, vector<8x32xf32>
    %cst_41 = arith.constant dense<0xFF800000> : vector<8xf32>
    %65 = vector.multi_reduction <maximumf>, %64, %cst_41 [1] : vector<8x32xf32> to vector<8xf32>
    %66 = vector.shape_cast %65 : vector<8xf32> to vector<8x1xf32>
    %67 = vector.broadcast %66 : vector<8x1xf32> to vector<8x32xf32>
    %68 = arith.subf %64, %67 : vector<8x32xf32>
    %69 = math.exp %68 : vector<8x32xf32>
    %cst_42 = arith.constant dense<0.000000e+00> : vector<8x32xf32>
    %70 = tpu.matmul %69, %1, %cst_42 {dimension_numbers = #tpu.dot_dimension_numbers<[1], [0], [0], [1], [0, 0, 1, 1], [], []>} : vector<8x32xf32>, vector<32x32xf32>, vector<8x32xf32> -> vector<8x32xf32>
    %71 = arith.divf %69, %70 : vector<8x32xf32>
    %c0_43 = arith.constant 0 : index
    %c1 = arith.constant 1 : index
    %c0_44 = arith.constant 0 : index
    %c0_45 = arith.constant 0 : index
    %72 = vector.load %arg25[%c0_43, %c1, %c0_44, %c0_45] : memref<2x2x8x32xf32, #tpu.memory_space<vmem>>, vector<1x1x8x32xf32>
    %73 = vector.shape_cast %72 : vector<1x1x8x32xf32> to vector<8x32xf32>
    %74 = vector.shape_cast %71 : vector<8x32xf32> to vector<1x1x8x32xf32>
    tpu.vector_store %arg25[%c0_43, %c1, %c0_44, %c0_45], %74 {strides = array<i32>} : memref<2x2x8x32xf32, #tpu.memory_space<vmem>>, vector<1x1x8x32xf32>,
    %cst_46 = arith.constant dense<0.000000e+00> : vector<8x32xf32>
    %75 = tpu.matmul %71, %59, %cst_46 {dimension_numbers = #tpu.dot_dimension_numbers<[1], [0], [0], [1], [0, 0, 1, 1], [], []>} : vector<8x32xf32>, vector<32x32xf32>, vector<8x32xf32> -> vector<8x32xf32>
    %76 = tpu.concatenate %52, %75 in 0 : vector<8x32xf32>, vector<8x32xf32> -> vector<16x32xf32>
    %c0_47 = arith.constant 0 : index
    %c0_48 = arith.constant 0 : index
    %c0_49 = arith.constant 0 : index
    %77 = vector.load %arg10[%c0_47, %c0_48, %c0_49] : memref<2x32x32xbf16, #tpu.memory_space<vmem>>, vector<1x32x32xbf16>
    %78 = vector.shape_cast %77 : vector<1x32x32xbf16> to vector<32x32xbf16>
    %79 = arith.truncf %76 : vector<16x32xf32> to vector<16x32xbf16>
    %cst_50 = arith.constant dense<0.000000e+00> : vector<16x32xf32>
    %80 = tpu.matmul %79, %78, %cst_50 {dimension_numbers = #tpu.dot_dimension_numbers<[1], [0], [0], [1], [0, 0, 1, 1], [], []>} : vector<16x32xbf16>, vector<32x32xbf16>, vector<16x32xf32> -> vector<16x32xf32>
    %c0_51 = arith.constant 0 : index
    %c0_52 = arith.constant 0 : index
    %c0_53 = arith.constant 0 : index
    %81 = vector.load %arg11[%c0_51, %c0_52, %c0_53] : memref<2x1x32xf32, #tpu.memory_space<vmem>>, vector<1x1x32xf32>
    %82 = vector.shape_cast %81 : vector<1x1x32xf32> to vector<1x32xf32>
    %83 = vector.broadcast %82 : vector<1x32xf32> to vector<16x32xf32>
    %84 = arith.addf %80, %83 : vector<16x32xf32>
    %85 = arith.addf %84, %5 : vector<16x32xf32>
    %c0_54 = arith.constant 0 : index
    %c0_55 = arith.constant 0 : index
    %c0_56 = arith.constant 0 : index
    %86 = vector.load %arg12[%c0_54, %c0_55, %c0_56] : memref<2x1x32xf32, #tpu.memory_space<vmem>>, vector<1x1x32xf32>
    %87 = vector.shape_cast %86 : vector<1x1x32xf32> to vector<1x32xf32>
    %c0_57 = arith.constant 0 : index
    %c0_58 = arith.constant 0 : index
    %c0_59 = arith.constant 0 : index
    %88 = vector.load %arg13[%c0_57, %c0_58, %c0_59] : memref<2x1x32xf32, #tpu.memory_space<vmem>>, vector<1x1x32xf32>
    %89 = vector.shape_cast %88 : vector<1x1x32xf32> to vector<1x32xf32>
    %cst_60 = arith.constant dense<0.000000e+00> : vector<16xf32>
    %90 = vector.multi_reduction <add>, %85, %cst_60 [1] : vector<16x32xf32> to vector<16xf32>
    %91 = vector.shape_cast %90 : vector<16xf32> to vector<16x1xf32>
    %cst_61 = arith.constant 3.200000e+01 : f32
    %92 = vector.broadcast %cst_61 : f32 to vector<16x1xf32>
    %93 = arith.divf %91, %92 : vector<16x1xf32>
    %94 = vector.broadcast %93 : vector<16x1xf32> to vector<16x32xf32>
    %95 = arith.subf %85, %94 : vector<16x32xf32>
    %96 = arith.mulf %95, %95 : vector<16x32xf32>
    %cst_62 = arith.constant dense<0.000000e+00> : vector<16xf32>
    %97 = vector.multi_reduction <add>, %96, %cst_62 [1] : vector<16x32xf32> to vector<16xf32>
    %98 = vector.shape_cast %97 : vector<16xf32> to vector<16x1xf32>
    %cst_63 = arith.constant 3.200000e+01 : f32
    %99 = vector.broadcast %cst_63 : f32 to vector<16x1xf32>
    %100 = arith.divf %98, %99 : vector<16x1xf32>
    %101 = vector.broadcast %93 : vector<16x1xf32> to vector<16x32xf32>
    %102 = arith.subf %85, %101 : vector<16x32xf32>
    %cst_64 = arith.constant 9.99999974E-6 : f32
    %103 = vector.broadcast %cst_64 : f32 to vector<16x1xf32>
    %104 = arith.addf %100, %103 : vector<16x1xf32>
    %105 = math.rsqrt %104 : vector<16x1xf32>
    %106 = vector.broadcast %105 : vector<16x1xf32> to vector<16x32xf32>
    %107 = arith.mulf %102, %106 : vector<16x32xf32>
    %108 = vector.broadcast %87 : vector<1x32xf32> to vector<16x32xf32>
    %109 = arith.mulf %107, %108 : vector<16x32xf32>
    %110 = vector.broadcast %89 : vector<1x32xf32> to vector<16x32xf32>
    %111 = arith.addf %109, %110 : vector<16x32xf32>
    %c0_65 = arith.constant 0 : index
    %c0_66 = arith.constant 0 : index
    %c0_67 = arith.constant 0 : index
    %112 = vector.load %arg14[%c0_65, %c0_66, %c0_67] : memref<2x32x64xbf16, #tpu.memory_space<vmem>>, vector<1x32x64xbf16>
    %113 = vector.shape_cast %112 : vector<1x32x64xbf16> to vector<32x64xbf16>
    %114 = arith.truncf %111 : vector<16x32xf32> to vector<16x32xbf16>
    %cst_68 = arith.constant dense<0.000000e+00> : vector<16x64xf32>
    %115 = tpu.matmul %114, %113, %cst_68 {dimension_numbers = #tpu.dot_dimension_numbers<[1], [0], [0], [1], [0, 0, 1, 1], [], []>} : vector<16x32xbf16>, vector<32x64xbf16>, vector<16x64xf32> -> vector<16x64xf32>
    %c0_69 = arith.constant 0 : index
    %c0_70 = arith.constant 0 : index
    %c0_71 = arith.constant 0 : index
    %116 = vector.load %arg15[%c0_69, %c0_70, %c0_71] : memref<2x1x64xf32, #tpu.memory_space<vmem>>, vector<1x1x64xf32>
    %117 = vector.shape_cast %116 : vector<1x1x64xf32> to vector<1x64xf32>
    %118 = vector.broadcast %117 : vector<1x64xf32> to vector<16x64xf32>
    %119 = arith.addf %115, %118 : vector<16x64xf32>
    %cst_72 = arith.constant 0.000000e+00 : f32
    %120 = vector.broadcast %cst_72 : f32 to vector<16x64xf32>
    %121 = arith.maximumf %119, %120 : vector<16x64xf32>
    %c0_73 = arith.constant 0 : index
    %c0_74 = arith.constant 0 : index
    %c0_75 = arith.constant 0 : index
    %122 = vector.load %arg16[%c0_73, %c0_74, %c0_75] : memref<2x64x32xbf16, #tpu.memory_space<vmem>>, vector<1x64x32xbf16>
    %123 = vector.shape_cast %122 : vector<1x64x32xbf16> to vector<64x32xbf16>
    %124 = arith.truncf %121 : vector<16x64xf32> to vector<16x64xbf16>
    %cst_76 = arith.constant dense<0.000000e+00> : vector<16x32xf32>
    %125 = tpu.matmul %124, %123, %cst_76 {dimension_numbers = #tpu.dot_dimension_numbers<[1], [0], [0], [1], [0, 0, 1, 1], [], []>} : vector<16x64xbf16>, vector<64x32xbf16>, vector<16x32xf32> -> vector<16x32xf32>
    %c0_77 = arith.constant 0 : index
    %c0_78 = arith.constant 0 : index
    %c0_79 = arith.constant 0 : index
    %126 = vector.load %arg17[%c0_77, %c0_78, %c0_79] : memref<2x1x32xf32, #tpu.memory_space<vmem>>, vector<1x1x32xf32>
    %127 = vector.shape_cast %126 : vector<1x1x32xf32> to vector<1x32xf32>
    %128 = vector.broadcast %127 : vector<1x32xf32> to vector<16x32xf32>
    %129 = arith.addf %125, %128 : vector<16x32xf32>
    %130 = arith.addf %129, %111 : vector<16x32xf32>
    %c0_80 = arith.constant 0 : index
    %c0_81 = arith.constant 0 : index
    %c0_82 = arith.constant 0 : index
    %131 = vector.load %arg18[%c0_80, %c0_81, %c0_82] : memref<2x1x32xf32, #tpu.memory_space<vmem>>, vector<1x1x32xf32>
    %132 = vector.shape_cast %131 : vector<1x1x32xf32> to vector<1x32xf32>
    %c0_83 = arith.constant 0 : index
    %c0_84 = arith.constant 0 : index
    %c0_85 = arith.constant 0 : index
    %133 = vector.load %arg19[%c0_83, %c0_84, %c0_85] : memref<2x1x32xf32, #tpu.memory_space<vmem>>, vector<1x1x32xf32>
    %134 = vector.shape_cast %133 : vector<1x1x32xf32> to vector<1x32xf32>
    %cst_86 = arith.constant dense<0.000000e+00> : vector<16xf32>
    %135 = vector.multi_reduction <add>, %130, %cst_86 [1] : vector<16x32xf32> to vector<16xf32>
    %136 = vector.shape_cast %135 : vector<16xf32> to vector<16x1xf32>
    %cst_87 = arith.constant 3.200000e+01 : f32
    %137 = vector.broadcast %cst_87 : f32 to vector<16x1xf32>
    %138 = arith.divf %136, %137 : vector<16x1xf32>
    %139 = vector.broadcast %138 : vector<16x1xf32> to vector<16x32xf32>
    %140 = arith.subf %130, %139 : vector<16x32xf32>
    %141 = arith.mulf %140, %140 : vector<16x32xf32>
    %cst_88 = arith.constant dense<0.000000e+00> : vector<16xf32>
    %142 = vector.multi_reduction <add>, %141, %cst_88 [1] : vector<16x32xf32> to vector<16xf32>
    %143 = vector.shape_cast %142 : vector<16xf32> to vector<16x1xf32>
    %cst_89 = arith.constant 3.200000e+01 : f32
    %144 = vector.broadcast %cst_89 : f32 to vector<16x1xf32>
    %145 = arith.divf %143, %144 : vector<16x1xf32>
    %146 = vector.broadcast %138 : vector<16x1xf32> to vector<16x32xf32>
    %147 = arith.subf %130, %146 : vector<16x32xf32>
    %cst_90 = arith.constant 9.99999974E-6 : f32
    %148 = vector.broadcast %cst_90 : f32 to vector<16x1xf32>
    %149 = arith.addf %145, %148 : vector<16x1xf32>
    %150 = math.rsqrt %149 : vector<16x1xf32>
    %151 = vector.broadcast %150 : vector<16x1xf32> to vector<16x32xf32>
    %152 = arith.mulf %147, %151 : vector<16x32xf32>
    %153 = vector.broadcast %132 : vector<1x32xf32> to vector<16x32xf32>
    %154 = arith.mulf %152, %153 : vector<16x32xf32>
    %155 = vector.broadcast %134 : vector<1x32xf32> to vector<16x32xf32>
    %156 = arith.addf %154, %155 : vector<16x32xf32>
    %c1_91 = arith.constant 1 : index
    %c0_92 = arith.constant 0 : index
    %c0_93 = arith.constant 0 : index
    %157 = vector.load %arg4[%c1_91, %c0_92, %c0_93] : memref<2x32x32xbf16, #tpu.memory_space<vmem>>, vector<1x32x32xbf16>
    %158 = vector.shape_cast %157 : vector<1x32x32xbf16> to vector<32x32xbf16>
    %159 = arith.truncf %156 : vector<16x32xf32> to vector<16x32xbf16>
    %cst_94 = arith.constant dense<0.000000e+00> : vector<16x32xf32>
    %160 = tpu.matmul %159, %158, %cst_94 {dimension_numbers = #tpu.dot_dimension_numbers<[1], [0], [0], [1], [0, 0, 1, 1], [], []>} : vector<16x32xbf16>, vector<32x32xbf16>, vector<16x32xf32> -> vector<16x32xf32>
    %c1_95 = arith.constant 1 : index
    %c0_96 = arith.constant 0 : index
    %c0_97 = arith.constant 0 : index
    %161 = vector.load %arg7[%c1_95, %c0_96, %c0_97] : memref<2x1x32xf32, #tpu.memory_space<vmem>>, vector<1x1x32xf32>
    %162 = vector.shape_cast %161 : vector<1x1x32xf32> to vector<1x32xf32>
    %163 = vector.broadcast %162 : vector<1x32xf32> to vector<16x32xf32>
    %164 = arith.addf %160, %163 : vector<16x32xf32>
    %c1_98 = arith.constant 1 : index
    %c0_99 = arith.constant 0 : index
    %c0_100 = arith.constant 0 : index
    %165 = vector.load %arg5[%c1_98, %c0_99, %c0_100] : memref<2x32x32xbf16, #tpu.memory_space<vmem>>, vector<1x32x32xbf16>
    %166 = vector.shape_cast %165 : vector<1x32x32xbf16> to vector<32x32xbf16>
    %167 = arith.truncf %156 : vector<16x32xf32> to vector<16x32xbf16>
    %cst_101 = arith.constant dense<0.000000e+00> : vector<16x32xf32>
    %168 = tpu.matmul %167, %166, %cst_101 {dimension_numbers = #tpu.dot_dimension_numbers<[1], [0], [0], [1], [0, 0, 1, 1], [], []>} : vector<16x32xbf16>, vector<32x32xbf16>, vector<16x32xf32> -> vector<16x32xf32>
    %c1_102 = arith.constant 1 : index
    %c0_103 = arith.constant 0 : index
    %c0_104 = arith.constant 0 : index
    %169 = vector.load %arg8[%c1_102, %c0_103, %c0_104] : memref<2x1x32xf32, #tpu.memory_space<vmem>>, vector<1x1x32xf32>
    %170 = vector.shape_cast %169 : vector<1x1x32xf32> to vector<1x32xf32>
    %171 = vector.broadcast %170 : vector<1x32xf32> to vector<16x32xf32>
    %172 = arith.addf %168, %171 : vector<16x32xf32>
    %c1_105 = arith.constant 1 : index
    %c0_106 = arith.constant 0 : index
    %c0_107 = arith.constant 0 : index
    %173 = vector.load %arg6[%c1_105, %c0_106, %c0_107] : memref<2x32x32xbf16, #tpu.memory_space<vmem>>, vector<1x32x32xbf16>
    %174 = vector.shape_cast %173 : vector<1x32x32xbf16> to vector<32x32xbf16>
    %175 = arith.truncf %156 : vector<16x32xf32> to vector<16x32xbf16>
    %cst_108 = arith.constant dense<0.000000e+00> : vector<16x32xf32>
    %176 = tpu.matmul %175, %174, %cst_108 {dimension_numbers = #tpu.dot_dimension_numbers<[1], [0], [0], [1], [0, 0, 1, 1], [], []>} : vector<16x32xbf16>, vector<32x32xbf16>, vector<16x32xf32> -> vector<16x32xf32>
    %c1_109 = arith.constant 1 : index
    %c0_110 = arith.constant 0 : index
    %c0_111 = arith.constant 0 : index
    %177 = vector.load %arg9[%c1_109, %c0_110, %c0_111] : memref<2x1x32xf32, #tpu.memory_space<vmem>>, vector<1x1x32xf32>
    %178 = vector.shape_cast %177 : vector<1x1x32xf32> to vector<1x32xf32>
    %179 = vector.broadcast %178 : vector<1x32xf32> to vector<16x32xf32>
    %180 = arith.addf %176, %179 : vector<16x32xf32>
    %181 = vector.extract_strided_slice %164 {offsets = [0, 0], sizes = [8, 32], strides = [1, 1]} : vector<16x32xf32> to vector<8x32xf32>
    %182 = vector.extract_strided_slice %172 {offsets = [0, 0], sizes = [8, 32], strides = [1, 1]} : vector<16x32xf32> to vector<8x32xf32>
    %183 = vector.extract_strided_slice %180 {offsets = [0, 0], sizes = [8, 32], strides = [1, 1]} : vector<16x32xf32> to vector<8x32xf32>
    %184 = tpu.concatenate %182, %182, %182, %182 in 0 : vector<8x32xf32>, vector<8x32xf32>, vector<8x32xf32>, vector<8x32xf32> -> vector<32x32xf32>
    %185 = arith.mulf %184, %0 : vector<32x32xf32>
    %186 = tpu.concatenate %183, %183, %183, %183 in 0 : vector<8x32xf32>, vector<8x32xf32>, vector<8x32xf32>, vector<8x32xf32> -> vector<32x32xf32>
    %187 = arith.mulf %186, %0 : vector<32x32xf32>
    %cst_112 = arith.constant dense<0.000000e+00> : vector<8x32xf32>
    %188 = tpu.matmul %181, %185, %cst_112 {dimension_numbers = #tpu.dot_dimension_numbers<[1], [1], [0], [0], [0, 0, 1, 0], [], []>} : vector<8x32xf32>, vector<32x32xf32>, vector<8x32xf32> -> vector<8x32xf32>
    %cst_113 = arith.constant 0.353553385 : f32
    %189 = vector.broadcast %cst_113 : f32 to vector<8x32xf32>
    %190 = arith.mulf %188, %189 : vector<8x32xf32>
    %cst_114 = arith.constant -1.000000e+30 : f32
    %191 = vector.broadcast %cst_114 : f32 to vector<8x32xf32>
    %192 = arith.select %4, %190, %191 : vector<8x32xi1>, vector<8x32xf32>
    %cst_115 = arith.constant dense<0xFF800000> : vector<8xf32>
    %193 = vector.multi_reduction <maximumf>, %192, %cst_115 [1] : vector<8x32xf32> to vector<8xf32>
    %194 = vector.shape_cast %193 : vector<8xf32> to vector<8x1xf32>
    %195 = vector.broadcast %194 : vector<8x1xf32> to vector<8x32xf32>
    %196 = arith.subf %192, %195 : vector<8x32xf32>
    %197 = math.exp %196 : vector<8x32xf32>
    %cst_116 = arith.constant dense<0.000000e+00> : vector<8x32xf32>
    %198 = tpu.matmul %197, %1, %cst_116 {dimension_numbers = #tpu.dot_dimension_numbers<[1], [0], [0], [1], [0, 0, 1, 1], [], []>} : vector<8x32xf32>, vector<32x32xf32>, vector<8x32xf32> -> vector<8x32xf32>
    %199 = arith.divf %197, %198 : vector<8x32xf32>
    %c1_117 = arith.constant 1 : index
    %c0_118 = arith.constant 0 : index
    %c0_119 = arith.constant 0 : index
    %c0_120 = arith.constant 0 : index
    %200 = vector.load %arg25[%c1_117, %c0_118, %c0_119, %c0_120] : memref<2x2x8x32xf32, #tpu.memory_space<vmem>>, vector<1x1x8x32xf32>
    %201 = vector.shape_cast %200 : vector<1x1x8x32xf32> to vector<8x32xf32>
    %202 = vector.shape_cast %199 : vector<8x32xf32> to vector<1x1x8x32xf32>
    tpu.vector_store %arg25[%c1_117, %c0_118, %c0_119, %c0_120], %202 {strides = array<i32>} : memref<2x2x8x32xf32, #tpu.memory_space<vmem>>, vector<1x1x8x32xf32>,
    %cst_121 = arith.constant dense<0.000000e+00> : vector<8x32xf32>
    %203 = tpu.matmul %199, %187, %cst_121 {dimension_numbers = #tpu.dot_dimension_numbers<[1], [0], [0], [1], [0, 0, 1, 1], [], []>} : vector<8x32xf32>, vector<32x32xf32>, vector<8x32xf32> -> vector<8x32xf32>
    %204 = vector.extract_strided_slice %164 {offsets = [8, 0], sizes = [8, 32], strides = [1, 1]} : vector<16x32xf32> to vector<8x32xf32>
    %205 = vector.extract_strided_slice %172 {offsets = [8, 0], sizes = [8, 32], strides = [1, 1]} : vector<16x32xf32> to vector<8x32xf32>
    %206 = vector.extract_strided_slice %180 {offsets = [8, 0], sizes = [8, 32], strides = [1, 1]} : vector<16x32xf32> to vector<8x32xf32>
    %207 = tpu.concatenate %205, %205, %205, %205 in 0 : vector<8x32xf32>, vector<8x32xf32>, vector<8x32xf32>, vector<8x32xf32> -> vector<32x32xf32>
    %208 = arith.mulf %207, %0 : vector<32x32xf32>
    %209 = tpu.concatenate %206, %206, %206, %206 in 0 : vector<8x32xf32>, vector<8x32xf32>, vector<8x32xf32>, vector<8x32xf32> -> vector<32x32xf32>
    %210 = arith.mulf %209, %0 : vector<32x32xf32>
    %cst_122 = arith.constant dense<0.000000e+00> : vector<8x32xf32>
    %211 = tpu.matmul %204, %208, %cst_122 {dimension_numbers = #tpu.dot_dimension_numbers<[1], [1], [0], [0], [0, 0, 1, 0], [], []>} : vector<8x32xf32>, vector<32x32xf32>, vector<8x32xf32> -> vector<8x32xf32>
    %cst_123 = arith.constant 0.353553385 : f32
    %212 = vector.broadcast %cst_123 : f32 to vector<8x32xf32>
    %213 = arith.mulf %211, %212 : vector<8x32xf32>
    %cst_124 = arith.constant -1.000000e+30 : f32
    %214 = vector.broadcast %cst_124 : f32 to vector<8x32xf32>
    %215 = arith.select %4, %213, %214 : vector<8x32xi1>, vector<8x32xf32>
    %cst_125 = arith.constant dense<0xFF800000> : vector<8xf32>
    %216 = vector.multi_reduction <maximumf>, %215, %cst_125 [1] : vector<8x32xf32> to vector<8xf32>
    %217 = vector.shape_cast %216 : vector<8xf32> to vector<8x1xf32>
    %218 = vector.broadcast %217 : vector<8x1xf32> to vector<8x32xf32>
    %219 = arith.subf %215, %218 : vector<8x32xf32>
    %220 = math.exp %219 : vector<8x32xf32>
    %cst_126 = arith.constant dense<0.000000e+00> : vector<8x32xf32>
    %221 = tpu.matmul %220, %1, %cst_126 {dimension_numbers = #tpu.dot_dimension_numbers<[1], [0], [0], [1], [0, 0, 1, 1], [], []>} : vector<8x32xf32>, vector<32x32xf32>, vector<8x32xf32> -> vector<8x32xf32>
    %222 = arith.divf %220, %221 : vector<8x32xf32>
    %c1_127 = arith.constant 1 : index
    %c1_128 = arith.constant 1 : index
    %c0_129 = arith.constant 0 : index
    %c0_130 = arith.constant 0 : index
    %223 = vector.load %arg25[%c1_127, %c1_128, %c0_129, %c0_130] : memref<2x2x8x32xf32, #tpu.memory_space<vmem>>, vector<1x1x8x32xf32>
    %224 = vector.shape_cast %223 : vector<1x1x8x32xf32> to vector<8x32xf32>
    %225 = vector.shape_cast %222 : vector<8x32xf32> to vector<1x1x8x32xf32>
    tpu.vector_store %arg25[%c1_127, %c1_128, %c0_129, %c0_130], %225 {strides = array<i32>} : memref<2x2x8x32xf32, #tpu.memory_space<vmem>>, vector<1x1x8x32xf32>,
    %cst_131 = arith.constant dense<0.000000e+00> : vector<8x32xf32>
    %226 = tpu.matmul %222, %210, %cst_131 {dimension_numbers = #tpu.dot_dimension_numbers<[1], [0], [0], [1], [0, 0, 1, 1], [], []>} : vector<8x32xf32>, vector<32x32xf32>, vector<8x32xf32> -> vector<8x32xf32>
    %227 = tpu.concatenate %203, %226 in 0 : vector<8x32xf32>, vector<8x32xf32> -> vector<16x32xf32>
    %c1_132 = arith.constant 1 : index
    %c0_133 = arith.constant 0 : index
    %c0_134 = arith.constant 0 : index
    %228 = vector.load %arg10[%c1_132, %c0_133, %c0_134] : memref<2x32x32xbf16, #tpu.memory_space<vmem>>, vector<1x32x32xbf16>
    %229 = vector.shape_cast %228 : vector<1x32x32xbf16> to vector<32x32xbf16>
    %230 = arith.truncf %227 : vector<16x32xf32> to vector<16x32xbf16>
    %cst_135 = arith.constant dense<0.000000e+00> : vector<16x32xf32>
    %231 = tpu.matmul %230, %229, %cst_135 {dimension_numbers = #tpu.dot_dimension_numbers<[1], [0], [0], [1], [0, 0, 1, 1], [], []>} : vector<16x32xbf16>, vector<32x32xbf16>, vector<16x32xf32> -> vector<16x32xf32>
    %c1_136 = arith.constant 1 : index
    %c0_137 = arith.constant 0 : index
    %c0_138 = arith.constant 0 : index
    %232 = vector.load %arg11[%c1_136, %c0_137, %c0_138] : memref<2x1x32xf32, #tpu.memory_space<vmem>>, vector<1x1x32xf32>
    %233 = vector.shape_cast %232 : vector<1x1x32xf32> to vector<1x32xf32>
    %234 = vector.broadcast %233 : vector<1x32xf32> to vector<16x32xf32>
    %235 = arith.addf %231, %234 : vector<16x32xf32>
    %236 = arith.addf %235, %156 : vector<16x32xf32>
    %c1_139 = arith.constant 1 : index
    %c0_140 = arith.constant 0 : index
    %c0_141 = arith.constant 0 : index
    %237 = vector.load %arg12[%c1_139, %c0_140, %c0_141] : memref<2x1x32xf32, #tpu.memory_space<vmem>>, vector<1x1x32xf32>
    %238 = vector.shape_cast %237 : vector<1x1x32xf32> to vector<1x32xf32>
    %c1_142 = arith.constant 1 : index
    %c0_143 = arith.constant 0 : index
    %c0_144 = arith.constant 0 : index
    %239 = vector.load %arg13[%c1_142, %c0_143, %c0_144] : memref<2x1x32xf32, #tpu.memory_space<vmem>>, vector<1x1x32xf32>
    %240 = vector.shape_cast %239 : vector<1x1x32xf32> to vector<1x32xf32>
    %cst_145 = arith.constant dense<0.000000e+00> : vector<16xf32>
    %241 = vector.multi_reduction <add>, %236, %cst_145 [1] : vector<16x32xf32> to vector<16xf32>
    %242 = vector.shape_cast %241 : vector<16xf32> to vector<16x1xf32>
    %cst_146 = arith.constant 3.200000e+01 : f32
    %243 = vector.broadcast %cst_146 : f32 to vector<16x1xf32>
    %244 = arith.divf %242, %243 : vector<16x1xf32>
    %245 = vector.broadcast %244 : vector<16x1xf32> to vector<16x32xf32>
    %246 = arith.subf %236, %245 : vector<16x32xf32>
    %247 = arith.mulf %246, %246 : vector<16x32xf32>
    %cst_147 = arith.constant dense<0.000000e+00> : vector<16xf32>
    %248 = vector.multi_reduction <add>, %247, %cst_147 [1] : vector<16x32xf32> to vector<16xf32>
    %249 = vector.shape_cast %248 : vector<16xf32> to vector<16x1xf32>
    %cst_148 = arith.constant 3.200000e+01 : f32
    %250 = vector.broadcast %cst_148 : f32 to vector<16x1xf32>
    %251 = arith.divf %249, %250 : vector<16x1xf32>
    %252 = vector.broadcast %244 : vector<16x1xf32> to vector<16x32xf32>
    %253 = arith.subf %236, %252 : vector<16x32xf32>
    %cst_149 = arith.constant 9.99999974E-6 : f32
    %254 = vector.broadcast %cst_149 : f32 to vector<16x1xf32>
    %255 = arith.addf %251, %254 : vector<16x1xf32>
    %256 = math.rsqrt %255 : vector<16x1xf32>
    %257 = vector.broadcast %256 : vector<16x1xf32> to vector<16x32xf32>
    %258 = arith.mulf %253, %257 : vector<16x32xf32>
    %259 = vector.broadcast %238 : vector<1x32xf32> to vector<16x32xf32>
    %260 = arith.mulf %258, %259 : vector<16x32xf32>
    %261 = vector.broadcast %240 : vector<1x32xf32> to vector<16x32xf32>
    %262 = arith.addf %260, %261 : vector<16x32xf32>
    %c1_150 = arith.constant 1 : index
    %c0_151 = arith.constant 0 : index
    %c0_152 = arith.constant 0 : index
    %263 = vector.load %arg14[%c1_150, %c0_151, %c0_152] : memref<2x32x64xbf16, #tpu.memory_space<vmem>>, vector<1x32x64xbf16>
    %264 = vector.shape_cast %263 : vector<1x32x64xbf16> to vector<32x64xbf16>
    %265 = arith.truncf %262 : vector<16x32xf32> to vector<16x32xbf16>
    %cst_153 = arith.constant dense<0.000000e+00> : vector<16x64xf32>
    %266 = tpu.matmul %265, %264, %cst_153 {dimension_numbers = #tpu.dot_dimension_numbers<[1], [0], [0], [1], [0, 0, 1, 1], [], []>} : vector<16x32xbf16>, vector<32x64xbf16>, vector<16x64xf32> -> vector<16x64xf32>
    %c1_154 = arith.constant 1 : index
    %c0_155 = arith.constant 0 : index
    %c0_156 = arith.constant 0 : index
    %267 = vector.load %arg15[%c1_154, %c0_155, %c0_156] : memref<2x1x64xf32, #tpu.memory_space<vmem>>, vector<1x1x64xf32>
    %268 = vector.shape_cast %267 : vector<1x1x64xf32> to vector<1x64xf32>
    %269 = vector.broadcast %268 : vector<1x64xf32> to vector<16x64xf32>
    %270 = arith.addf %266, %269 : vector<16x64xf32>
    %cst_157 = arith.constant 0.000000e+00 : f32
    %271 = vector.broadcast %cst_157 : f32 to vector<16x64xf32>
    %272 = arith.maximumf %270, %271 : vector<16x64xf32>
    %c1_158 = arith.constant 1 : index
    %c0_159 = arith.constant 0 : index
    %c0_160 = arith.constant 0 : index
    %273 = vector.load %arg16[%c1_158, %c0_159, %c0_160] : memref<2x64x32xbf16, #tpu.memory_space<vmem>>, vector<1x64x32xbf16>
    %274 = vector.shape_cast %273 : vector<1x64x32xbf16> to vector<64x32xbf16>
    %275 = arith.truncf %272 : vector<16x64xf32> to vector<16x64xbf16>
    %cst_161 = arith.constant dense<0.000000e+00> : vector<16x32xf32>
    %276 = tpu.matmul %275, %274, %cst_161 {dimension_numbers = #tpu.dot_dimension_numbers<[1], [0], [0], [1], [0, 0, 1, 1], [], []>} : vector<16x64xbf16>, vector<64x32xbf16>, vector<16x32xf32> -> vector<16x32xf32>
    %c1_162 = arith.constant 1 : index
    %c0_163 = arith.constant 0 : index
    %c0_164 = arith.constant 0 : index
    %277 = vector.load %arg17[%c1_162, %c0_163, %c0_164] : memref<2x1x32xf32, #tpu.memory_space<vmem>>, vector<1x1x32xf32>
    %278 = vector.shape_cast %277 : vector<1x1x32xf32> to vector<1x32xf32>
    %279 = vector.broadcast %278 : vector<1x32xf32> to vector<16x32xf32>
    %280 = arith.addf %276, %279 : vector<16x32xf32>
    %281 = arith.addf %280, %262 : vector<16x32xf32>
    %c1_165 = arith.constant 1 : index
    %c0_166 = arith.constant 0 : index
    %c0_167 = arith.constant 0 : index
    %282 = vector.load %arg18[%c1_165, %c0_166, %c0_167] : memref<2x1x32xf32, #tpu.memory_space<vmem>>, vector<1x1x32xf32>
    %283 = vector.shape_cast %282 : vector<1x1x32xf32> to vector<1x32xf32>
    %c1_168 = arith.constant 1 : index
    %c0_169 = arith.constant 0 : index
    %c0_170 = arith.constant 0 : index
    %284 = vector.load %arg19[%c1_168, %c0_169, %c0_170] : memref<2x1x32xf32, #tpu.memory_space<vmem>>, vector<1x1x32xf32>
    %285 = vector.shape_cast %284 : vector<1x1x32xf32> to vector<1x32xf32>
    %cst_171 = arith.constant dense<0.000000e+00> : vector<16xf32>
    %286 = vector.multi_reduction <add>, %281, %cst_171 [1] : vector<16x32xf32> to vector<16xf32>
    %287 = vector.shape_cast %286 : vector<16xf32> to vector<16x1xf32>
    %cst_172 = arith.constant 3.200000e+01 : f32
    %288 = vector.broadcast %cst_172 : f32 to vector<16x1xf32>
    %289 = arith.divf %287, %288 : vector<16x1xf32>
    %290 = vector.broadcast %289 : vector<16x1xf32> to vector<16x32xf32>
    %291 = arith.subf %281, %290 : vector<16x32xf32>
    %292 = arith.mulf %291, %291 : vector<16x32xf32>
    %cst_173 = arith.constant dense<0.000000e+00> : vector<16xf32>
    %293 = vector.multi_reduction <add>, %292, %cst_173 [1] : vector<16x32xf32> to vector<16xf32>
    %294 = vector.shape_cast %293 : vector<16xf32> to vector<16x1xf32>
    %cst_174 = arith.constant 3.200000e+01 : f32
    %295 = vector.broadcast %cst_174 : f32 to vector<16x1xf32>
    %296 = arith.divf %294, %295 : vector<16x1xf32>
    %297 = vector.broadcast %289 : vector<16x1xf32> to vector<16x32xf32>
    %298 = arith.subf %281, %297 : vector<16x32xf32>
    %cst_175 = arith.constant 9.99999974E-6 : f32
    %299 = vector.broadcast %cst_175 : f32 to vector<16x1xf32>
    %300 = arith.addf %296, %299 : vector<16x1xf32>
    %301 = math.rsqrt %300 : vector<16x1xf32>
    %302 = vector.broadcast %301 : vector<16x1xf32> to vector<16x32xf32>
    %303 = arith.mulf %298, %302 : vector<16x32xf32>
    %304 = vector.broadcast %283 : vector<1x32xf32> to vector<16x32xf32>
    %305 = arith.mulf %303, %304 : vector<16x32xf32>
    %306 = vector.broadcast %285 : vector<1x32xf32> to vector<16x32xf32>
    %307 = arith.addf %305, %306 : vector<16x32xf32>
    %c0_176 = arith.constant 0 : index
    %c0_177 = arith.constant 0 : index
    %308 = vector.load %arg20[%c0_176, %c0_177] : memref<1x32xf32, #tpu.memory_space<vmem>>, vector<1x32xf32>
    %c0_178 = arith.constant 0 : index
    %c0_179 = arith.constant 0 : index
    %309 = vector.load %arg21[%c0_178, %c0_179] : memref<1x32xf32, #tpu.memory_space<vmem>>, vector<1x32xf32>
    %cst_180 = arith.constant dense<0.000000e+00> : vector<16xf32>
    %310 = vector.multi_reduction <add>, %307, %cst_180 [1] : vector<16x32xf32> to vector<16xf32>
    %311 = vector.shape_cast %310 : vector<16xf32> to vector<16x1xf32>
    %cst_181 = arith.constant 3.200000e+01 : f32
    %312 = vector.broadcast %cst_181 : f32 to vector<16x1xf32>
    %313 = arith.divf %311, %312 : vector<16x1xf32>
    %314 = vector.broadcast %313 : vector<16x1xf32> to vector<16x32xf32>
    %315 = arith.subf %307, %314 : vector<16x32xf32>
    %316 = arith.mulf %315, %315 : vector<16x32xf32>
    %cst_182 = arith.constant dense<0.000000e+00> : vector<16xf32>
    %317 = vector.multi_reduction <add>, %316, %cst_182 [1] : vector<16x32xf32> to vector<16xf32>
    %318 = vector.shape_cast %317 : vector<16xf32> to vector<16x1xf32>
    %cst_183 = arith.constant 3.200000e+01 : f32
    %319 = vector.broadcast %cst_183 : f32 to vector<16x1xf32>
    %320 = arith.divf %318, %319 : vector<16x1xf32>
    %321 = vector.broadcast %313 : vector<16x1xf32> to vector<16x32xf32>
    %322 = arith.subf %307, %321 : vector<16x32xf32>
    %cst_184 = arith.constant 9.99999974E-6 : f32
    %323 = vector.broadcast %cst_184 : f32 to vector<16x1xf32>
    %324 = arith.addf %320, %323 : vector<16x1xf32>
    %325 = math.rsqrt %324 : vector<16x1xf32>
    %326 = vector.broadcast %325 : vector<16x1xf32> to vector<16x32xf32>
    %327 = arith.mulf %322, %326 : vector<16x32xf32>
    %328 = vector.broadcast %308 : vector<1x32xf32> to vector<16x32xf32>
    %329 = arith.mulf %327, %328 : vector<16x32xf32>
    %330 = vector.broadcast %309 : vector<1x32xf32> to vector<16x32xf32>
    %331 = arith.addf %329, %330 : vector<16x32xf32>
    %c0_185 = arith.constant 0 : index
    %c0_186 = arith.constant 0 : index
    %332 = vector.load %arg22[%c0_185, %c0_186] : memref<32x64xbf16, #tpu.memory_space<vmem>>, vector<32x64xbf16>
    %333 = arith.truncf %331 : vector<16x32xf32> to vector<16x32xbf16>
    %cst_187 = arith.constant dense<0.000000e+00> : vector<16x64xf32>
    %334 = tpu.matmul %333, %332, %cst_187 {dimension_numbers = #tpu.dot_dimension_numbers<[1], [0], [0], [1], [0, 0, 1, 1], [], []>} : vector<16x32xbf16>, vector<32x64xbf16>, vector<16x64xf32> -> vector<16x64xf32>
    %c0_188 = arith.constant 0 : index
    %c0_189 = arith.constant 0 : index
    %335 = vector.load %arg23[%c0_188, %c0_189] : memref<1x64xf32, #tpu.memory_space<vmem>>, vector<1x64xf32>
    %336 = vector.broadcast %335 : vector<1x64xf32> to vector<16x64xf32>
    %337 = arith.addf %334, %336 : vector<16x64xf32>
    %c0_190 = arith.constant 0 : index
    %c0_191 = arith.constant 0 : index
    %338 = vector.load %arg24[%c0_190, %c0_191] : memref<16x64xf32, #tpu.memory_space<vmem>>, vector<16x64xf32>
    tpu.vector_store %arg24[%c0_190, %c0_191], %337 {strides = array<i32>} : memref<16x64xf32, #tpu.memory_space<vmem>>, vector<16x64xf32>,
    return
  }
}

</mosaic_0001>

<bundles_post_ra>
// kernel: decoder_only_transformer.1
= control target key start
LH: loop header
LB: loop body
LE: loop exit
PB: predicated region body
PF: predicated region fallthrough
CT: control target
= control target key end

     0   :  { %s2247_s0 = inlined_call_operand.vmem [shape: f32[16,32], index: 0, kind: input, shape index: {}]   ;;  %s2248_s1 = inlined_call_operand.vmem [shape: f32[32,32], index: 1, kind: input, shape index: {}, may-alias: {1,2}]   ;;  %s2249_s2 = inlined_call_operand.vmem [shape: f32[32,32], index: 2, kind: input, shape index: {}, may-alias: {1,2}]   ;;  %s2250_s3 = inlined_call_operand.vmem [shape: f32[8,32], index: 3, kind: input, shape index: {}]   ;;  %s2251_s4 = inlined_call_operand.vmem [shape: bf16[2,32,32], index: 4, kind: input, shape index: {}]   ;;  %s2252_s5 = inlined_call_operand.vmem [shape: bf16[2,32,32], index: 5, kind: input, shape index: {}]   ;;  %s2253_s6 = inlined_call_operand.vmem [shape: bf16[2,32,32], index: 6, kind: input, shape index: {}]   ;;  %s2254_s7 = inlined_call_operand.vmem [shape: f32[2,1,32], index: 7, kind: input, shape index: {}]   ;;  %s2255_s8 = inlined_call_operand.vmem [shape: f32[2,1,32], index: 8, kind: input, shape index: {}]   ;;  %s2256_s9 = inlined_call_operand.vmem [shape: f32[2,1,32], index: 9, kind: input, shape index: {}]   ;;  %s2257_s10 = inlined_call_operand.vmem [shape: bf16[2,32,32], index: 10, kind: input, shape index: {}]   ;;  %s2258_s11 = inlined_call_operand.vmem [shape: f32[2,1,32], index: 11, kind: input, shape index: {}]   ;;  %s2259_s12 = inlined_call_operand.vmem [shape: f32[2,1,32], index: 12, kind: input, shape index: {}]   ;;  %s2260_s13 = inlined_call_operand.vmem [shape: f32[2,1,32], index: 13, kind: input, shape index: {}]   ;;  %s2261_s14 = inlined_call_operand.vmem [shape: bf16[2,32,64], index: 14, kind: input, shape index: {}]   ;;  %s2262_s15 = inlined_call_operand.vmem [shape: f32[2,1,64], index: 15, kind: input, shape index: {}]   ;;  %s2263_s16 = inlined_call_operand.vmem [shape: bf16[2,64,32], index: 16, kind: input, shape index: {}]   ;;  %s2264_s17 = inlined_call_operand.vmem [shape: f32[2,1,32], index: 17, kind: input, shape index: {}]   ;;  %s2265_s18 = inlined_call_operand.vmem [shape: f32[2,1,32], index: 18, kind: input, shape index: {}]   ;;  %s2266_s19 = inlined_call_operand.vmem [shape: f32[2,1,32], index: 19, kind: input, shape index: {}]   ;;  %s2267_s20 = inlined_call_operand.vmem [shape: f32[1,32], index: 20, kind: input, shape index: {}]   ;;  %s2268_s21 = inlined_call_operand.vmem [shape: f32[1,32], index: 21, kind: input, shape index: {}]   ;;  %s2269_s22 = inlined_call_operand.vmem [shape: bf16[32,64], index: 22, kind: input, shape index: {}]   ;;  %s2270_s23 = inlined_call_operand.vmem [shape: f32[1,64], index: 23, kind: input, shape index: {}]   ;;  %s2271_s24 = inlined_call_operand.hbm [shape: f32[16,64], index: 24, kind: output, shape index: {0}]   ;;  %s2272_s25 = inlined_call_operand.vmem [shape: f32[2,2,8,32], index: 25, kind: output, shape index: {1}]  }
   0x1   :  { %2282 = sst [smem:[#allocation5_spill]] %s2247_s0 }
   0x2   :  { %2283 = sst [smem:[#allocation6_spill]] %s2248_s1 }
   0x3   :  { %2284 = sst [smem:[#allocation7_spill]] %s2249_s2 }
   0x4   :  { %2285 = sst [smem:[#allocation8_spill]] %s2250_s3 }
   0x5   :  { %2286 = sst [smem:[#allocation9_spill]] %s2251_s4 }
   0x6   :  { %2287 = sst [smem:[#allocation10_spill]] %s2252_s5 }
   0x7   :  { %2288 = sst [smem:[#allocation11_spill]] %s2253_s6 }
   0x8   :  { %2289 = sst [smem:[#allocation12_spill]] %s2254_s7 }
   0x9   :  { %2290 = sst [smem:[#allocation13_spill]] %s2255_s8 }
   0xa   :  { %2291 = sst [smem:[#allocation14_spill]] %s2256_s9 }
   0xb   :  { %s2292_s6 = sld [smem:[#allocation10_spill]]  ;;  %vm114_vm0 = vcmask 261120  }
   0xc   :  { %s2293_s1 = sld [smem:[#allocation5_spill]] }
   0xd   :  { %s2294_s9 = sld [smem:[#allocation9_spill]] }
   0xe   :  { %s2295_s30 = sld [smem:[#allocation11_spill]] }
  0x11   :  { %v1604_v0 = vld [vmem:[%s2292_s6 + $0x8] sm:$0xff]  ;;  %v1603_v1 = vld [vmem:[%s2292_s6] sm:$0xff] }
  0x12   :  { %v1865_v2 = vld [vmem:[%s2293_s1] sm:$0xff]  ;;  %v1870_v3 = vld [vmem:[%s2293_s1 + $0x8] sm:$0xff]  ;;  %158 = vmatpush.bf16.msra.mxu1 %v1604_v0 }
  0x13   :  { %v1602_v4 = vld [vmem:[%s2294_s9 + $0x8] sm:$0xff]  ;;  %v1601_v5 = vld [vmem:[%s2294_s9] sm:$0xff]  ;;  %v97_v8 = vpack.c.bf16 %v1870_v3, %v1865_v2 }
  0x14   :  { %v1606_v6 = vld [vmem:[%s2295_s30 + $0x8] sm:$0xff]  ;;  %124 = vmatpush.bf16.msra.mxu0 %v1602_v4  ;;  %v1605_v7 = vld [vmem:[%s2295_s30] sm:$0xff] }
  0x15   :  { %192 = vmatpush.bf16.msra.mxu2 %v1606_v6 }
  0x16   :  { %159 = vmatpush.bf16.msra.mxu1 %v1603_v1 }
  0x18   :  { %125 = vmatpush.bf16.msra.mxu0 %v1601_v5 }
  0x19   :  { %193 = vmatpush.bf16.msra.mxu2 %v1605_v7  ;;  %1416 = vmatmul.msk.bf16.vlgmr.msra.gmra.mxu1 %vm114_vm0, %v97_v8 }
  0x1b   :  { %1407 = vmatmul.msk.bf16.vlgmr.msra.gmra.mxu0 %vm114_vm0, %v97_v8 }
  0x1c   :  { %31 = vsyncpa [#allocation3], 0  ;;  %1425 = vmatmul.msk.bf16.vlgmr.msra.gmra.mxu2 %vm114_vm0, %v97_v8  ;;  %s2296_s8 = sld [smem:[#allocation7_spill]]  ;;  %v1608_v1 = vld [vmem:[%s2257_s10 + $0x8] sm:$0xff] }
  0x1d   :  { %s2297_s0 = sld [smem:[#allocation13_spill]] }
  0x1e   :  { %s2298_s26 = sld [smem:[#allocation6_spill]] }
  0x1f   :  { %s2299_s2 = sld [smem:[#allocation14_spill]] }
  0x20   :  { %s2300_s27 = sld [smem:[#allocation12_spill]] }
  0x21   :  { %s2301_s29 = sld [smem:[#allocation8_spill]] }
  0x22   :  { %v1892_v9 = vld [vmem:[%s2296_s8 + $0x18] sm:$0xff]  ;;  %v1897_v10 = vld [vmem:[%s2296_s8 + $0x10] sm:$0xff]  ;;  %v1906_v12 = vld [vmem:[%s2296_s8 + $0x8] sm:$0xff] }
  0x23   :  { %v1635_v11 = vld [vmem:[%s2297_s0] ss:$0 sm:$0xff]  ;;  %266 = vmatpush.msrb.mxu0 %v1892_v9 }
  0x24   :  { %v1912_v14 = vld [vmem:[%s2298_s26 + $0x18] sm:$0xff]  ;;  %v1917_v15 = vld [vmem:[%s2296_s8] sm:$0xff]  ;;  %v1925_v18 = vld [vmem:[%s2298_s26 + $0x10] sm:$0xff] }
  0x25   :  { %267 = vmatpush.msrb.mxu0 %v1897_v10  ;;  %v1637_v19 = vld [vmem:[%s2299_s2] ss:$0 sm:$0xff]  ;;  %v1935_v22 = vld [vmem:[%s2298_s26 + $0x8] sm:$0xff] }
  0x26   :  { %v1636_v28 = vld [vmem:[%s2300_s27] ss:$0 sm:$0xff] }
  0x27   :  { %268 = vmatpush.msrb.mxu0 %v1906_v12  ;;  %v1946_v29 = vld [vmem:[%s2298_s26] sm:$0xff] }
  0x28   :  { %v1975_v48 = vld [vmem:[%s2301_s29] sm:$0xff] }
  0x29   :  { %269 = vmatpush.msrb.mxu0 %v1917_v15  ;;  %vm90_vm1 = vcmp.gt.f32.partialorder %v1975_v48, 0.5 }
  0x96   :  { %v161_v13 = vpop.f32.mrf.mxu1 }
  0x97   :  { %v162_v16 = vadd.f32 %v1635_v11, %v161_v13 }
  0x98   :  { %v127_v32 = vpop.f32.mrf.mxu0 }
  0x99   :  { %v203_v17 = vmul.f32 %v162_v16, %v1912_v14  ;;  %v202_v20 = vmul.f32 %v162_v16, %v1925_v18  ;;  %v201_v26 = vmul.f32 %v162_v16, %v1935_v22  ;;  %v200_v34 = vmul.f32 %v162_v16, %v1946_v29 }
  0x9a   :  { %v128_v36 = vadd.f32 %v1636_v28, %v127_v32 }
  0x9b   :  { %1426 = vmatpush.xpose.msk.msra.mxu3 %vm114_vm0, %v203_v17 }
  0x9e   :  { %v163_v21 = vpop.f32.mrf.mxu1 }
  0x9f   :  { %v195_v23 = vpop.f32.mrf.mxu2  ;;  %v164_v24 = vadd.f32 %v1635_v11, %v163_v21  ;;  %1427 = vmatpush.xpose.msk.msra.mxu3 %vm114_vm0, %v202_v20 }
  0xa0   :  { %v196_v25 = vadd.f32 %v1637_v19, %v195_v23  ;;  %v129_v44 = vpop.f32.mrf.mxu0 }
  0xa1   :  { %v316_v27 = vmul.f32 %v164_v24, %v1912_v14  ;;  %v315_v35 = vmul.f32 %v164_v24, %v1925_v18  ;;  %v314_v40 = vmul.f32 %v164_v24, %v1935_v22  ;;  %v313_v45 = vmul.f32 %v164_v24, %v1946_v29 }
  0xa2   :  { %v207_v30 = vmul.f32 %v196_v25, %v1912_v14  ;;  %v206_v31 = vmul.f32 %v196_v25, %v1925_v18  ;;  %v205_v33 = vmul.f32 %v196_v25, %v1935_v22  ;;  %v204_v38 = vmul.f32 %v196_v25, %v1946_v29 }
  0xa3   :  { %1428 = vmatpush.xpose.msk.msra.mxu3 %vm114_vm0, %v201_v26  ;;  %1433 = vmatpush.xpose.msk.msrb.mxu2 %vm114_vm0, %v316_v27  ;;  %v130_v47 = vadd.f32 %v1636_v28, %v129_v44 }
  0xa4   :  { %305 = vmatpush.msrb.mxu1 %v207_v30 }
  0xa6   :  { %306 = vmatpush.msrb.mxu1 %v206_v31 }
  0xa7   :  { %v197_v37 = vpop.f32.mrf.mxu2  ;;  %1429 = vmatpush.xpose.msk.msra.mxu3 %vm114_vm0, %v200_v34  ;;  %1434 = vmatpush.xpose.msk.msrb.mxu2 %vm114_vm0, %v315_v35 }
  0xa8   :  { %v198_v39 = vadd.f32 %v1637_v19, %v197_v37  ;;  %307 = vmatpush.msrb.mxu1 %v205_v33 }
  0xaa   :  { %v320_v41 = vmul.f32 %v198_v39, %v1912_v14  ;;  %v319_v42 = vmul.f32 %v198_v39, %v1925_v18  ;;  %1430 = vmatmul.msk.f32.vlgmr.msra.gmra.mxu3 %vm114_vm0, %v128_v36  ;;  %308 = vmatpush.msrb.mxu1 %v204_v38  ;;  %v318_v43 = vmul.f32 %v198_v39, %v1935_v22  ;;  %v1607_v36 = vld [vmem:[%s2257_s10] sm:$0xff] }
  0xab   :  { %379 = vmatpush.msrb.mxu3 %v1892_v9  ;;  %1435 = vmatpush.xpose.msk.msrb.mxu2 %vm114_vm0, %v314_v40  ;;  %v317_v46 = vmul.f32 %v198_v39, %v1946_v29  ;;  %v1638_v40 = vld [vmem:[%s2258_s11] ss:$0 sm:$0xff] }
  0xac   :  { %419 = vmatpush.msra.mxu0 %v320_v41  ;;  %457 = vmatpush.bf16.msra.mxu1 %v1608_v1  ;;  %v1610_v1 = vld [vmem:[%s2261_s14 + $0x8] sm:$0xff] }
  0xad   :  { %380 = vmatpush.msrb.mxu3 %v1897_v10 }
  0xae   :  { %420 = vmatpush.msra.mxu0 %v319_v42 }
  0xaf   :  { %381 = vmatpush.msrb.mxu3 %v1906_v12  ;;  %1436 = vmatpush.xpose.msk.msrb.mxu2 %vm114_vm0, %v313_v45 }
  0xb0   :  { %421 = vmatpush.msra.mxu0 %v318_v43  ;;  %458 = vmatpush.bf16.msra.mxu1 %v1607_v36 }
  0xb1   :  { %382 = vmatpush.msrb.mxu3 %v1917_v15 }
  0xb2   :  { %422 = vmatpush.msra.mxu0 %v317_v46  ;;  %1437 = vmatmul.msk.f32.vlgmr.msrb.gmra.mxu2 %vm114_vm0, %v130_v47 }
  0xb3   :  { %560 = vmatpush.bf16.msra.mxu2 %v1610_v1 }
 0x12d   :  { %v240_v51 = vpop.f32.mrf.mxu3 }
 0x12e   :  { %v243_v54 = vmul.f32 0.35355338, %v240_v51 }
 0x130   :  { %v244_v55 = vsel %vm90_vm1, %v243_v54, -1e+30 }
 0x131   :  { %v245_v56 = vsel %vm114_vm0, %v244_v55, -inf }
 0x135   :  { %v353_v49 = vpop.f32.mrf.mxu2 }
 0x136   :  { %v356_v50 = vmul.f32 0.35355338, %v353_v49 }
 0x138   :  { %v357_v52 = vsel %vm90_vm1, %v356_v50, -1e+30  ;;  %v1722_v50 = vmov 32.0  }
 0x139   :  { %v358_v53 = vsel %vm114_vm0, %v357_v52, -inf }
 0x13a   :  { %359 = vmax.xlane.f32.xlu0 %v358_v53 }
 0x142   :  { %246 = vmax.xlane.f32.xlu0 %v245_v56 }
 0x1ad   :  { %v360_v57 = vpop.xlane.xlu0 %359 }
 0x1ae   :  { %v361_v58 = vsub.f32 %v357_v52, %v360_v57 }
 0x1b0   :  { %v362_v59 = vmul.f32 1.442695, %v361_v58 }
 0x1b2   :  { %1658 = vpow2.f32 %v362_v59 }
 0x1b5   :  { %v247_v60 = vpop.xlane.xlu0 %246 }
 0x1b6   :  { %v248_v61 = vsub.f32 %v244_v55, %v247_v60 }
 0x1b8   :  { %v1659_v62 = vpop.eup %1658  ;;  %v249_v63 = vmul.f32 1.442695, %v248_v61 }
 0x1b9   :  { %1438 = vmatmul.msk.f32.vlgmr.msrb.gmra.mxu3 %vm114_vm0, %v1659_v62 }
 0x1ba   :  { %1660 = vpow2.f32 %v249_v63 }
 0x1c0   :  { %v1661_v0 = vpop.eup %1660 }
 0x1c1   :  { %1431 = vmatmul.msk.f32.vlgmr.msrb.gmra.mxu0 %vm114_vm0, %v1661_v0 }
 0x23c   :  { %v384_v4 = vpop.f32.mrf.mxu3 }
 0x23d   :  { %1662 = vrcp.f32 %v384_v4  ;;  %v398_v16 = vand.u32 2147483648, %v384_v4  ;;  %v396_v19 = vand.u32 2147483647, %v384_v4  ;;  %vm392_vm3 = vweird.f32 %v384_v4 }
 0x23e   :  { %v271_v5 = vpop.f32.mrf.mxu0 }
 0x23f   :  { %1664 = vrcp.f32 %v271_v5  ;;  %v285_v21 = vand.u32 2147483648, %v271_v5  ;;  %v283_v25 = vand.u32 2147483647, %v271_v5  ;;  %v399_v26 = vor.u32 1.1754944e-38, %v398_v16 }
 0x240   :  { %vm397_vm6 = vcmp.eq.f32.partialorder %v396_v19, 8.507059e+37  ;;  %vm279_vm7 = vweird.f32 %v271_v5  ;;  %1666 = vrcp.f32 %v1722_v50 }
 0x241   :  { %v286_v31 = vor.u32 1.1754944e-38, %v285_v21  ;;  %vm284_vm9 = vcmp.eq.f32.partialorder %v283_v25, 8.507059e+37 }
 0x243   :  { %v1663_v6 = vpop.eup %1662 }
 0x244   :  { %v388_v7 = vmul.f32 %v1663_v6, %v384_v4  ;;  %vm393_vm2 = vweird.f32 %v1663_v6 }
 0x245   :  { %v1665_v8 = vpop.eup %1664  ;;  %vm394_vm5 = vmor %vm392_vm3, %vm393_vm2  ;;  %vm607_vm3 = vcmask 523264  }
 0x246   :  { %v389_v11 = vsub.f32 1.0, %v388_v7  ;;  %v275_v13 = vmul.f32 %v1665_v8, %v271_v5  ;;  %vm280_vm4 = vweird.f32 %v1665_v8  ;;  %v1667_v51 = vpop.eup %1666  ;;  %v1609_v7 = vld [vmem:[%s2261_s14] sm:$0xff] }
 0x247   :  { %vm281_vm8 = vmor %vm279_vm7, %vm280_vm4  ;;  %v476_v52 = vmul.f32 32.0, %v1667_v51  ;;  %vm480_vm10 = vweird.f32 %v1667_v51  ;;  %561 = vmatpush.bf16.msra.mxu2 %v1609_v7 }
 0x248   :  { %v390_v17 = vmul.f32 %v1663_v6, %v389_v11  ;;  %v276_v20 = vsub.f32 1.0, %v275_v13 }
 0x249   :  { %v477_v53 = vsub.f32 1.0, %v476_v52 }
 0x24a   :  { %v391_v23 = vadd.f32 %v1663_v6, %v390_v17  ;;  %v277_v24 = vmul.f32 %v1665_v8, %v276_v20 }
 0x24b   :  { %v478_v54 = vmul.f32 %v1667_v51, %v477_v53 }
 0x24c   :  { %v395_v27 = vsel %vm394_vm5, %v1663_v6, %v391_v23  ;;  %v278_v28 = vadd.f32 %v1665_v8, %v277_v24 }
 0x24d   :  { %v400_v30 = vsel %vm397_vm6, %v399_v26, %v395_v27  ;;  %v479_v55 = vadd.f32 %v1667_v51, %v478_v54 }
 0x24e   :  { %v401_v32 = vmul.f32 %v1659_v62, %v400_v30  ;;  %v282_v33 = vsel %vm281_vm8, %v1665_v8, %v278_v28 }
 0x24f   :  { %v287_v34 = vsel %vm284_vm9, %v286_v31, %v282_v33  ;;  %v2010_v56 = vsel %vm480_vm10, %v1667_v51, %v479_v55  ;;  %v1639_v31 = vld [vmem:[%s2259_s12] ss:$0 sm:$0xff] }
 0x250   :  { %1439 = vst.msk [vmem:[%s2272_s25 + $0x8] sm:$0xff] %vm114_vm0, %v401_v32  ;;  %1440 = vmatmul.msk.f32.vlgmr.msra.gmra.mxu0 %vm114_vm0, %v401_v32  ;;  %v288_v35 = vmul.f32 %v1661_v0, %v287_v34  ;;  %v1642_v55 = vld [vmem:[%s2264_s17] ss:$0 sm:$0xff] }
 0x252   :  { %289 = vst.msk [vmem:[%s2272_s25] sm:$0xff] %vm114_vm0, %v288_v35  ;;  %1432 = vmatmul.msk.f32.vlgmr.msrb.gmra.mxu1 %vm114_vm0, %v288_v35  ;;  %v1640_v35 = vld [vmem:[%s2260_s13] ss:$0 sm:$0xff] }
 0x2cd   :  { %v424_v37 = vpop.f32.mrf.mxu0 }
 0x2cf   :  { %v310_v38 = vpop.f32.mrf.mxu1 }
 0x2d0   :  { %v431_v39 = vpack.c.bf16 %v424_v37, %v310_v38 }
 0x2d2   :  { %1449 = vmatmul.msk.bf16.vlgmr.msra.gmra.mxu1 %vm114_vm0, %v431_v39 }
 0x34f   :  { %v460_v41 = vpop.f32.mrf.mxu1 }
 0x350   :  { %v461_v42 = vadd.f32 %v1638_v40, %v460_v41 }
 0x352   :  { %v465_v43 = vadd.f32 %v461_v42, %v1865_v2  ;;  %v1614_v42 = vld [vmem:[%s2263_s16 + $0x18] sm:$0xff] }
 0x353   :  { %615 = vmatpush.bf16.msra.mxu3 %v1614_v42 }
 0x354   :  { %v469_v44 = vsel %vm114_vm0, %v465_v43, 0.0 }
 0x355   :  { %470 = vadd.xlane.f32.xlu1 %v469_v44  ;;  %v1612_v44 = vld [vmem:[%s2263_s16 + $0x8] sm:$0xff] }
 0x357   :  { %v462_v45 = vpop.f32.mrf.mxu1 }
 0x358   :  { %v463_v46 = vadd.f32 %v1638_v40, %v462_v45  ;;  %v1611_v45 = vld [vmem:[%s2263_s16] sm:$0xff] }
 0x35a   :  { %v466_v47 = vadd.f32 %v463_v46, %v1870_v3 }
 0x35c   :  { %v472_v49 = vsel %vm114_vm0, %v466_v47, 0.0 }
 0x35d   :  { %473 = vadd.xlane.f32.xlu1 %v472_v49 }
 0x3c8   :  { %v471_v2 = vpop.xlane.xlu1 %470 }
 0x3c9   :  { %v482_v57 = vmul.f32 %v2010_v56, %v471_v2 }
 0x3cb   :  { %v484_v58 = vsub.f32 %v465_v43, %v482_v57  ;;  %v1613_v43 = vld [vmem:[%s2263_s16 + $0x10] sm:$0xff] }
 0x3cc   :  { %616 = vmatpush.bf16.msra.mxu3 %v1613_v43  ;;  %v1644_v43 = vld [vmem:[%s2266_s19] ss:$0 sm:$0xff] }
 0x3cd   :  { %v486_v59 = vmul.f32 %v484_v58, %v484_v58 }
 0x3cf   :  { %v488_v3 = vsel %vm114_vm0, %v486_v59, 0.0 }
 0x3d0   :  { %489 = vadd.xlane.f32.xlu2 %v488_v3  ;;  %v474_v60 = vpop.xlane.xlu1 %473  ;;  %617 = vmatpush.bf16.msra.mxu3 %v1612_v44 }
 0x3d1   :  { %v483_v61 = vmul.f32 %v2010_v56, %v474_v60 }
 0x3d3   :  { %v485_v62 = vsub.f32 %v466_v47, %v483_v61  ;;  %v1641_v47 = vld [vmem:[%s2262_s15] ss:$0 sm:$0xff] }
 0x3d4   :  { %618 = vmatpush.bf16.msra.mxu3 %v1611_v45 }
 0x3d5   :  { %v487_v63 = vmul.f32 %v485_v62, %v485_v62 }
 0x3d7   :  { %v491_v0 = vsel %vm114_vm0, %v487_v63, 0.0 }
 0x3d8   :  { %492 = vadd.xlane.f32.xlu2 %v491_v0  ;;  %861 = vmatpush.msrb.mxu3 %v1892_v9 }
 0x3da   :  { %862 = vmatpush.msrb.mxu3 %v1897_v10 }
 0x3dc   :  { %863 = vmatpush.msrb.mxu3 %v1906_v12 }
 0x3de   :  { %864 = vmatpush.msrb.mxu3 %v1917_v15 }
 0x443   :  { %v490_v4 = vpop.xlane.xlu2 %489 }
 0x444   :  { %v494_v5 = vmul.f32 %v490_v4, %v2010_v56 }
 0x446   :  { %v496_v6 = vadd.f32 1e-05, %v494_v5 }
 0x448   :  { %1668 = vrsqrt.f32 %v496_v6  ;;  %vm504_vm12 = vweird.f32 %v496_v6 }
 0x44b   :  { %v493_v8 = vpop.xlane.xlu2 %492 }
 0x44c   :  { %v495_v11 = vmul.f32 %v493_v8, %v2010_v56 }
 0x44e   :  { %v1669_v13 = vpop.eup %1668  ;;  %v497_v16 = vadd.f32 1e-05, %v495_v11 }
 0x44f   :  { %v499_v17 = vmul.f32 %v1669_v13, %v496_v6  ;;  %vm505_vm11 = vweird.f32 %v1669_v13 }
 0x450   :  { %1670 = vrsqrt.f32 %v497_v16  ;;  %vm506_vm13 = vmor %vm504_vm12, %vm505_vm11  ;;  %vm514_vm15 = vweird.f32 %v497_v16 }
 0x451   :  { %v500_v19 = vmul.f32 %v1669_v13, %v499_v17  ;;  %v1616_v17 = vld [vmem:[%s2294_s9 + $0x18] sm:$0xff] }
 0x452   :  { %715 = vmatpush.bf16.msrb.mxu0 %v1616_v17 }
 0x453   :  { %v501_v20 = vmul.f32 0.5, %v500_v19  ;;  %v1620_v19 = vld [vmem:[%s2295_s30 + $0x18] sm:$0xff] }
 0x454   :  { %787 = vmatpush.bf16.msrb.mxu2 %v1620_v19 }
 0x455   :  { %v502_v21 = vsub.f32 1.5, %v501_v20 }
 0x456   :  { %v1671_v23 = vpop.eup %1670 }
 0x457   :  { %v503_v24 = vmul.f32 %v1669_v13, %v502_v21  ;;  %v509_v25 = vmul.f32 %v1671_v23, %v497_v16  ;;  %vm515_vm14 = vweird.f32 %v1671_v23  ;;  %v1618_v16 = vld [vmem:[%s2292_s6 + $0x18] sm:$0xff] }
 0x458   :  { %vm516_vm2 = vmor %vm514_vm15, %vm515_vm14  ;;  %751 = vmatpush.bf16.msrb.mxu1 %v1618_v16 }
 0x459   :  { %v510_v26 = vmul.f32 %v1671_v23, %v509_v25  ;;  %v507_v27 = vsel %vm506_vm13, %v1669_v13, %v503_v24  ;;  %v1617_v24 = vld [vmem:[%s2292_s6 + $0x10] sm:$0xff] }
 0x45a   :  { %v518_v32 = vmul.f32 %v507_v27, %v484_v58  ;;  %v1615_v25 = vld [vmem:[%s2294_s9 + $0x10] sm:$0xff] }
 0x45b   :  { %v511_v28 = vmul.f32 0.5, %v510_v26  ;;  %v1619_v26 = vld [vmem:[%s2295_s30 + $0x10] sm:$0xff]  ;;  %716 = vmatpush.bf16.msrb.mxu0 %v1615_v25 }
 0x45c   :  { %v523_v36 = vmul.f32 %v1639_v31, %v518_v32  ;;  %752 = vmatpush.bf16.msrb.mxu1 %v1617_v24  ;;  %788 = vmatpush.bf16.msrb.mxu2 %v1619_v26 }
 0x45d   :  { %v512_v30 = vsub.f32 1.5, %v511_v28 }
 0x45e   :  { %v528_v39 = vadd.f32 %v1640_v35, %v523_v36 }
 0x45f   :  { %v513_v33 = vmul.f32 %v1671_v23, %v512_v30 }
 0x461   :  { %v517_v34 = vsel %vm516_vm2, %v1671_v23, %v513_v33 }
 0x462   :  { %v519_v37 = vmul.f32 %v517_v34, %v485_v62 }
 0x464   :  { %v524_v38 = vmul.f32 %v1639_v31, %v519_v37 }
 0x466   :  { %v529_v40 = vadd.f32 %v1640_v35, %v524_v38 }
 0x468   :  { %v534_v41 = vpack.c.bf16 %v529_v40, %v528_v39 }
 0x46a   :  { %1458 = vmatmul.msk.bf16.vlgmr.msra.gmra.mxu2 %vm114_vm0, %v534_v41 }
 0x46b   :  { %975 = vmatpush.msra.mxu2 %v1892_v9 }
 0x46d   :  { %976 = vmatpush.msra.mxu2 %v1897_v10 }
 0x46f   :  { %977 = vmatpush.msra.mxu2 %v1906_v12  ;;  %v1643_v12 = vld [vmem:[%s2265_s18] ss:$0 sm:$0xff] }
 0x471   :  { %978 = vmatpush.msra.mxu2 %v1917_v15 }
 0x4ed   :  { %v563_v46 = vpop.f32.mrf.mxu2 }
 0x4ee   :  { %v564_v49 = vadd.f32 %v1641_v47, %v563_v46 }
 0x4f0   :  { %v568_v52 = vmax.f32 %v564_v49, 0.0 }
 0x4f5   :  { %v565_v50 = vpop.f32.mrf.mxu2 }
 0x4f6   :  { %v566_v51 = vadd.f32 %v1641_v47, %v565_v50 }
 0x4f8   :  { %v569_v53 = vmax.f32 %v566_v51, 0.0  ;;  %v1646_v51 = vld [vmem:[%s2297_s0 + $0x1] ss:$0 sm:$0xff] }
 0x4fa   :  { %v578_v54 = vpack.c.bf16 %v569_v53, %v568_v52 }
 0x4fc   :  { %1475 = vmatmul.msk.bf16.vlgmr.msra.gmra.mxu3 %vm607_vm3, %v578_v54 }
 0x57f   :  { %v620_v2 = vpop.f32.mrf.mxu3 }
 0x580   :  { %v621_v57 = vadd.f32 %v1642_v55, %v620_v2 }
 0x582   :  { %v625_v58 = vadd.f32 %v621_v57, %v528_v39  ;;  %v1647_v57 = vld [vmem:[%s2299_s2 + $0x1] ss:$0 sm:$0xff]  ;;  %s1383_s2 = sshll.u32 %s2271_s24, 4  ;;  %s1384_s2 = int_to_ptr.hbm [resolvable:$true] %s1383_s2 }
 0x584   :  { %v629_v59 = vsel %vm114_vm0, %v625_v58, 0.0 }
 0x585   :  { %630 = vadd.xlane.f32.xlu0 %v629_v59 }
 0x587   :  { %v622_v3 = vpop.f32.mrf.mxu3 }
 0x588   :  { %v623_v60 = vadd.f32 %v1642_v55, %v622_v3 }
 0x58a   :  { %v626_v61 = vadd.f32 %v623_v60, %v529_v40 }
 0x58c   :  { %v632_v62 = vsel %vm114_vm0, %v626_v61, 0.0 }
 0x58d   :  { %633 = vadd.xlane.f32.xlu1 %v632_v62 }
 0x5f8   :  { %v631_v63 = vpop.xlane.xlu0 %630 }
 0x5f9   :  { %v635_v0 = vmul.f32 %v631_v63, %v2010_v56  ;;  %v1645_v63 = vld [vmem:[%s2300_s27 + $0x1] ss:$0 sm:$0xff]  ;;  %s1725_s27 = smov 8  }
 0x5fb   :  { %v637_v1 = vsub.f32 %v625_v58, %v635_v0 }
 0x5fd   :  { %v639_v4 = vmul.f32 %v637_v1, %v637_v1 }
 0x5ff   :  { %v641_v5 = vsel %vm114_vm0, %v639_v4, 0.0 }
 0x600   :  { %v634_v6 = vpop.xlane.xlu1 %633  ;;  %642 = vadd.xlane.f32.xlu2 %v641_v5 }
 0x601   :  { %v636_v7 = vmul.f32 %v634_v6, %v2010_v56 }
 0x603   :  { %v638_v8 = vsub.f32 %v626_v61, %v636_v7 }
 0x605   :  { %v640_v11 = vmul.f32 %v638_v8, %v638_v8 }
 0x607   :  { %v644_v13 = vsel %vm114_vm0, %v640_v11, 0.0 }
 0x608   :  { %645 = vadd.xlane.f32.xlu0 %v644_v13 }
 0x673   :  { %v643_v20 = vpop.xlane.xlu2 %642 }
 0x674   :  { %v647_v21 = vmul.f32 %v643_v20, %v2010_v56 }
 0x676   :  { %v649_v23 = vadd.f32 1e-05, %v647_v21 }
 0x678   :  { %1672 = vrsqrt.f32 %v649_v23  ;;  %vm657_vm5 = vweird.f32 %v649_v23 }
 0x67b   :  { %v646_v27 = vpop.xlane.xlu0 %645 }
 0x67c   :  { %v648_v28 = vmul.f32 %v646_v27, %v2010_v56 }
 0x67e   :  { %v1673_v30 = vpop.eup %1672  ;;  %v650_v31 = vadd.f32 1e-05, %v648_v28 }
 0x67f   :  { %v652_v32 = vmul.f32 %v1673_v30, %v649_v23  ;;  %vm658_vm4 = vweird.f32 %v1673_v30 }
 0x680   :  { %1674 = vrsqrt.f32 %v650_v31  ;;  %vm659_vm6 = vmor %vm657_vm5, %vm658_vm4  ;;  %vm667_vm8 = vweird.f32 %v650_v31 }
 0x681   :  { %v653_v33 = vmul.f32 %v1673_v30, %v652_v32 }
 0x683   :  { %v654_v34 = vmul.f32 0.5, %v653_v33 }
 0x685   :  { %v655_v35 = vsub.f32 1.5, %v654_v34 }
 0x686   :  { %v1675_v36 = vpop.eup %1674 }
 0x687   :  { %v656_v37 = vmul.f32 %v1673_v30, %v655_v35  ;;  %v662_v9 = vmul.f32 %v1675_v36, %v650_v31  ;;  %vm668_vm7 = vweird.f32 %v1675_v36 }
 0x688   :  { %vm669_vm9 = vmor %vm667_vm8, %vm668_vm7 }
 0x689   :  { %v663_v38 = vmul.f32 %v1675_v36, %v662_v9  ;;  %v660_v39 = vsel %vm659_vm6, %v1673_v30, %v656_v37 }
 0x68a   :  { %v671_v41 = vmul.f32 %v660_v39, %v637_v1 }
 0x68b   :  { %v664_v10 = vmul.f32 0.5, %v663_v38 }
 0x68c   :  { %v676_v44 = vmul.f32 %v1643_v12, %v671_v41 }
 0x68d   :  { %v665_v40 = vsub.f32 1.5, %v664_v10 }
 0x68e   :  { %v2090_v47 = vadd.f32 %v1644_v43, %v676_v44 }
 0x68f   :  { %v666_v15 = vmul.f32 %v1675_v36, %v665_v40 }
 0x691   :  { %v670_v42 = vsel %vm669_vm9, %v1675_v36, %v666_v15 }
 0x692   :  { %v672_v45 = vmul.f32 %v670_v42, %v638_v8 }
 0x694   :  { %v677_v46 = vmul.f32 %v1643_v12, %v672_v45 }
 0x696   :  { %v2092_v49 = vadd.f32 %v1644_v43, %v677_v46 }
 0x698   :  { %v688_v50 = vpack.c.bf16 %v2092_v49, %v2090_v47 }
 0x69a   :  { %1489 = vmatmul.msk.bf16.vlgmr.msrb.gmra.mxu0 %vm114_vm0, %v688_v50  ;;  %1503 = vmatmul.msk.bf16.vlgmr.msrb.gmra.mxu1 %vm114_vm0, %v688_v50 }
 0x69b   :  { %1517 = vmatmul.msk.bf16.vlgmr.msrb.gmra.mxu2 %vm114_vm0, %v688_v50 }
 0x717   :  { %v754_v52 = vpop.f32.mrf.mxu1  ;;  %v718_v62 = vpop.f32.mrf.mxu0 }
 0x718   :  { %v755_v53 = vadd.f32 %v1646_v51, %v754_v52  ;;  %v719_v7 = vadd.f32 %v1645_v63, %v718_v62 }
 0x71a   :  { %v798_v54 = vmul.f32 %v755_v53, %v1912_v14  ;;  %v797_v2 = vmul.f32 %v755_v53, %v1925_v18  ;;  %v796_v60 = vmul.f32 %v755_v53, %v1935_v22  ;;  %v795_v1 = vmul.f32 %v755_v53, %v1946_v29 }
 0x71c   :  { %1518 = vmatpush.xpose.msk.msra.mxu0 %vm114_vm0, %v798_v54 }
 0x71e   :  { %v790_v55 = vpop.f32.mrf.mxu2 }
 0x71f   :  { %v756_v58 = vpop.f32.mrf.mxu1  ;;  %v791_v61 = vadd.f32 %v1647_v57, %v790_v55  ;;  %v720_v20 = vpop.f32.mrf.mxu0 }
 0x720   :  { %v757_v59 = vadd.f32 %v1646_v51, %v756_v58  ;;  %1519 = vmatpush.xpose.msk.msra.mxu0 %vm114_vm0, %v797_v2 }
 0x721   :  { %v802_v6 = vmul.f32 %v791_v61, %v1912_v14  ;;  %v801_v11 = vmul.f32 %v791_v61, %v1925_v18  ;;  %v800_v17 = vmul.f32 %v791_v61, %v1935_v22 }
 0x722   :  { %v912_v3 = vmul.f32 %v757_v59, %v1912_v14  ;;  %v911_v4 = vmul.f32 %v757_v59, %v1925_v18  ;;  %v910_v13 = vmul.f32 %v757_v59, %v1935_v22  ;;  %v909_v21 = vmul.f32 %v757_v59, %v1946_v29 }
 0x724   :  { %1520 = vmatpush.xpose.msk.msra.mxu0 %vm114_vm0, %v796_v60  ;;  %1526 = vmatpush.xpose.msk.msra.mxu1 %vm114_vm0, %v912_v3  ;;  %v1622_v60 = vld [vmem:[%s2257_s10 + $0x18] sm:$0xff] }
 0x726   :  { %v792_v0 = vpop.f32.mrf.mxu2 }
 0x727   :  { %v793_v5 = vadd.f32 %v1647_v57, %v792_v0 }
 0x728   :  { %1521 = vmatpush.xpose.msk.msra.mxu0 %vm114_vm0, %v795_v1  ;;  %1527 = vmatpush.xpose.msk.msra.mxu1 %vm114_vm0, %v911_v4  ;;  %v1648_v1 = vld [vmem:[%s2258_s11 + $0x1] ss:$0 sm:$0xff] }
 0x729   :  { %v916_v8 = vmul.f32 %v793_v5, %v1912_v14  ;;  %v915_v16 = vmul.f32 %v793_v5, %v1925_v18  ;;  %v914_v19 = vmul.f32 %v793_v5, %v1935_v22  ;;  %v799_v14 = vmul.f32 %v791_v61, %v1946_v29  ;;  %v1621_v61 = vld [vmem:[%s2257_s10 + $0x10] sm:$0xff] }
 0x72a   :  { %v913_v23 = vmul.f32 %v793_v5, %v1946_v29  ;;  %v721_v18 = vadd.f32 %v1645_v63, %v720_v20 }
 0x72b   :  { %1015 = vmatpush.msra.mxu3 %v916_v8  ;;  %1522 = vmatmul.msk.f32.vlgmr.msra.gmra.mxu0 %vm114_vm0, %v719_v7 }
 0x72c   :  { %901 = vmatpush.msrb.mxu0 %v802_v6  ;;  %1528 = vmatpush.xpose.msk.msra.mxu1 %vm114_vm0, %v910_v13 }
 0x72d   :  { %1016 = vmatpush.msra.mxu3 %v915_v16 }
 0x72e   :  { %902 = vmatpush.msrb.mxu0 %v801_v11 }
 0x72f   :  { %1017 = vmatpush.msra.mxu3 %v914_v19 }
 0x730   :  { %903 = vmatpush.msrb.mxu0 %v800_v17  ;;  %1529 = vmatpush.xpose.msk.msra.mxu1 %vm114_vm0, %v909_v21 }
 0x731   :  { %1018 = vmatpush.msra.mxu3 %v913_v23 }
 0x732   :  { %904 = vmatpush.msrb.mxu0 %v799_v14 }
 0x733   :  { %1530 = vmatmul.msk.f32.vlgmr.msra.gmra.mxu1 %vm114_vm0, %v721_v18 }
 0x734   :  { %1055 = vmatpush.bf16.msra.mxu0 %v1622_v60 }
 0x738   :  { %1056 = vmatpush.bf16.msra.mxu0 %v1621_v61 }
 0x7a8   :  { %v835_v24 = vpop.f32.mrf.mxu0 }
 0x7a9   :  { %v838_v25 = vmul.f32 0.35355338, %v835_v24 }
 0x7ab   :  { %v839_v22 = vsel %vm90_vm1, %v838_v25, -1e+30 }
 0x7ac   :  { %v840_v26 = vsel %vm114_vm0, %v839_v22, -inf }
 0x7ad   :  { %841 = vmax.xlane.f32.xlu2 %v840_v26 }
 0x7b0   :  { %v949_v27 = vpop.f32.mrf.mxu1 }
 0x7b1   :  { %v952_v28 = vmul.f32 0.35355338, %v949_v27 }
 0x7b3   :  { %v953_v29 = vsel %vm90_vm1, %v952_v28, -1e+30  ;;  %v1623_v28 = vld [vmem:[%s2261_s14 + $0x10] sm:$0xff] }
 0x7b4   :  { %v954_v30 = vsel %vm114_vm0, %v953_v29, -inf }
 0x7b5   :  { %955 = vmax.xlane.f32.xlu1 %v954_v30 }
 0x820   :  { %v842_v31 = vpop.xlane.xlu2 %841 }
 0x821   :  { %v843_v32 = vsub.f32 %v839_v22, %v842_v31 }
 0x823   :  { %v844_v33 = vmul.f32 1.442695, %v843_v32 }
 0x825   :  { %1676 = vpow2.f32 %v844_v33 }
 0x828   :  { %v956_v34 = vpop.xlane.xlu1 %955 }
 0x829   :  { %v957_v35 = vsub.f32 %v953_v29, %v956_v34 }
 0x82b   :  { %v1677_v36 = vpop.eup %1676  ;;  %v958_v37 = vmul.f32 1.442695, %v957_v35 }
 0x82c   :  { %1523 = vmatmul.msk.f32.vlgmr.msrb.gmra.mxu3 %vm114_vm0, %v1677_v36 }
 0x82d   :  { %1678 = vpow2.f32 %v958_v37 }
 0x833   :  { %v1679_v9 = vpop.eup %1678 }
 0x834   :  { %1531 = vmatmul.msk.f32.vlgmr.msra.gmra.mxu2 %vm114_vm0, %v1679_v9 }
 0x8af   :  { %v866_v38 = vpop.f32.mrf.mxu3 }
 0x8b0   :  { %1680 = vrcp.f32 %v866_v38  ;;  %v880_v12 = vand.u32 2147483648, %v866_v38  ;;  %v878_v15 = vand.u32 2147483647, %v866_v38  ;;  %vm874_vm10 = vweird.f32 %v866_v38 }
 0x8b2   :  { %v881_v44 = vor.u32 1.1754944e-38, %v880_v12  ;;  %vm879_vm12 = vcmp.eq.f32.partialorder %v878_v15, 8.507059e+37  ;;  %v1649_v12 = vld [vmem:[%s2259_s12 + $0x1] ss:$0 sm:$0xff]  ;;  %s1724_s12 = smov 128  }
 0x8b6   :  { %v1681_v48 = vpop.eup %1680 }
 0x8b7   :  { %v870_v39 = vmul.f32 %v1681_v48, %v866_v38  ;;  %v980_v10 = vpop.f32.mrf.mxu2  ;;  %vm875_vm1 = vweird.f32 %v1681_v48 }
 0x8b8   :  { %1682 = vrcp.f32 %v980_v10  ;;  %vm876_vm11 = vmor %vm874_vm10, %vm875_vm1  ;;  %v994_v53 = vand.u32 2147483648, %v980_v10  ;;  %v992_v55 = vand.u32 2147483647, %v980_v10  ;;  %vm988_vm14 = vweird.f32 %v980_v10 }
 0x8b9   :  { %v871_v40 = vsub.f32 1.0, %v870_v39 }
 0x8ba   :  { %v995_v57 = vor.u32 1.1754944e-38, %v994_v53  ;;  %vm993_vm2 = vcmp.eq.f32.partialorder %v992_v55, 8.507059e+37  ;;  %v1628_v53 = vld [vmem:[%s2263_s16 + $0x38] sm:$0xff]  ;;  %v1626_v55 = vld [vmem:[%s2263_s16 + $0x28] sm:$0xff] }
 0x8bb   :  { %v872_v41 = vmul.f32 %v1681_v48, %v871_v40  ;;  %1211 = vmatpush.bf16.msrb.mxu2 %v1628_v53 }
 0x8bd   :  { %v873_v42 = vadd.f32 %v1681_v48, %v872_v41 }
 0x8be   :  { %v1683_v43 = vpop.eup %1682 }
 0x8bf   :  { %v877_v45 = vsel %vm876_vm11, %v1681_v48, %v873_v42  ;;  %v984_v46 = vmul.f32 %v1683_v43, %v980_v10  ;;  %vm989_vm13 = vweird.f32 %v1683_v43 }
 0x8c0   :  { %v882_v50 = vsel %vm879_vm12, %v881_v44, %v877_v45  ;;  %vm990_vm15 = vmor %vm988_vm14, %vm989_vm13 }
 0x8c1   :  { %v985_v51 = vsub.f32 1.0, %v984_v46  ;;  %v883_v52 = vmul.f32 %v1677_v36, %v882_v50 }
 0x8c3   :  { %v986_v54 = vmul.f32 %v1683_v43, %v985_v51  ;;  %1524 = vst.msk [vmem:[%s2272_s25 + $0x10] sm:$0xff] %vm114_vm0, %v883_v52  ;;  %1525 = vmatmul.msk.f32.vlgmr.msrb.gmra.mxu0 %vm114_vm0, %v883_v52 }
 0x8c5   :  { %v987_v2 = vadd.f32 %v1683_v43, %v986_v54  ;;  %v1627_v54 = vld [vmem:[%s2263_s16 + $0x30] sm:$0xff] }
 0x8c6   :  { %1212 = vmatpush.bf16.msrb.mxu2 %v1627_v54 }
 0x8c7   :  { %v991_v58 = vsel %vm990_vm15, %v1683_v43, %v987_v2  ;;  %v1650_v43 = vld [vmem:[%s2260_s13 + $0x1] ss:$0 sm:$0xff] }
 0x8c8   :  { %v996_v59 = vsel %vm993_vm2, %v995_v57, %v991_v58  ;;  %v1625_v2 = vld [vmem:[%s2263_s16 + $0x20] sm:$0xff] }
 0x8c9   :  { %v997_v3 = vmul.f32 %v1679_v9, %v996_v59  ;;  %v1651_v58 = vld [vmem:[%s2262_s15 + $0x1] ss:$0 sm:$0xff] }
 0x8ca   :  { %1213 = vmatpush.bf16.msrb.mxu2 %v1626_v55 }
 0x8cb   :  { %1532 = vst.msk [vmem:[%s2272_s25 + $0x18] sm:$0xff] %vm114_vm0, %v997_v3  ;;  %1533 = vmatmul.msk.f32.vlgmr.msra.gmra.mxu3 %vm114_vm0, %v997_v3 }
 0x8ce   :  { %1214 = vmatpush.bf16.msrb.mxu2 %v1625_v2 }
 0x940   :  { %v906_v62 = vpop.f32.mrf.mxu0 }
 0x94e   :  { %v1020_v63 = vpop.f32.mrf.mxu3 }
 0x94f   :  { %v1028_v0 = vpack.c.bf16 %v1020_v63, %v906_v62 }
 0x951   :  { %1547 = vmatmul.msk.bf16.vlgmr.msra.gmra.mxu0 %vm114_vm0, %v1028_v0  ;;  %v1652_v0 = vld [vmem:[%s2264_s17 + $0x1] ss:$0 sm:$0xff] }
 0x9ce   :  { %v1058_v4 = vpop.f32.mrf.mxu0 }
 0x9cf   :  { %v1059_v5 = vadd.f32 %v1648_v1, %v1058_v4 }
 0x9d1   :  { %v1063_v6 = vadd.f32 %v1059_v5, %v2090_v47 }
 0x9d3   :  { %v1069_v7 = vsel %vm114_vm0, %v1063_v6, 0.0 }
 0x9d4   :  { %1070 = vadd.xlane.f32.xlu0 %v1069_v7 }
 0x9d6   :  { %v1060_v8 = vpop.f32.mrf.mxu0 }
 0x9d7   :  { %v1061_v11 = vadd.f32 %v1648_v1, %v1060_v8 }
 0x9d9   :  { %v1064_v13 = vadd.f32 %v1061_v11, %v2092_v49  ;;  %v1624_v49 = vld [vmem:[%s2261_s14 + $0x18] sm:$0xff] }
 0x9da   :  { %1155 = vmatpush.bf16.msrb.mxu1 %v1624_v49 }
 0x9db   :  { %v1072_v16 = vsel %vm114_vm0, %v1064_v13, 0.0 }
 0x9dc   :  { %1073 = vadd.xlane.f32.xlu1 %v1072_v16 }
 0x9de   :  { %1156 = vmatpush.bf16.msrb.mxu1 %v1623_v28 }
 0xa47   :  { %v1071_v17 = vpop.xlane.xlu0 %1070 }
 0xa48   :  { %v1075_v19 = vmul.f32 %v1071_v17, %v2010_v56 }
 0xa4a   :  { %v1077_v20 = vsub.f32 %v1063_v6, %v1075_v19 }
 0xa4c   :  { %v1079_v14 = vmul.f32 %v1077_v20, %v1077_v20 }
 0xa4e   :  { %v1081_v21 = vsel %vm114_vm0, %v1079_v14, 0.0 }
 0xa4f   :  { %v1074_v23 = vpop.xlane.xlu1 %1073  ;;  %1082 = vadd.xlane.f32.xlu2 %v1081_v21 }
 0xa50   :  { %v1076_v47 = vmul.f32 %v1074_v23, %v2010_v56 }
 0xa52   :  { %v1078_v18 = vsub.f32 %v1064_v13, %v1076_v47 }
 0xa54   :  { %v1080_v24 = vmul.f32 %v1078_v18, %v1078_v18 }
 0xa56   :  { %v1084_v25 = vsel %vm114_vm0, %v1080_v24, 0.0 }
 0xa57   :  { %1085 = vadd.xlane.f32.xlu0 %v1084_v25 }
 0xac2   :  { %v1083_v22 = vpop.xlane.xlu2 %1082 }
 0xac3   :  { %v1087_v26 = vmul.f32 %v1083_v22, %v2010_v56 }
 0xac5   :  { %v1089_v27 = vadd.f32 1e-05, %v1087_v26 }
 0xac7   :  { %1684 = vrsqrt.f32 %v1089_v27  ;;  %vm1097_vm5 = vweird.f32 %v1089_v27 }
 0xaca   :  { %v1086_v29 = vpop.xlane.xlu0 %1085 }
 0xacb   :  { %v1088_v30 = vmul.f32 %v1086_v29, %v2010_v56 }
 0xacd   :  { %v1685_v31 = vpop.eup %1684  ;;  %v1090_v32 = vadd.f32 1e-05, %v1088_v30 }
 0xace   :  { %v1092_v33 = vmul.f32 %v1685_v31, %v1089_v27  ;;  %vm1098_vm4 = vweird.f32 %v1685_v31 }
 0xacf   :  { %1686 = vrsqrt.f32 %v1090_v32  ;;  %vm1099_vm6 = vmor %vm1097_vm5, %vm1098_vm4  ;;  %vm1107_vm8 = vweird.f32 %v1090_v32 }
 0xad0   :  { %v1093_v34 = vmul.f32 %v1685_v31, %v1092_v33 }
 0xad2   :  { %v1094_v35 = vmul.f32 0.5, %v1093_v34 }
 0xad4   :  { %v1095_v36 = vsub.f32 1.5, %v1094_v35 }
 0xad5   :  { %v1687_v37 = vpop.eup %1686 }
 0xad6   :  { %v1096_v9 = vmul.f32 %v1685_v31, %v1095_v36  ;;  %v1102_v38 = vmul.f32 %v1687_v37, %v1090_v32  ;;  %vm1108_vm7 = vweird.f32 %v1687_v37 }
 0xad7   :  { %vm1109_vm9 = vmor %vm1107_vm8, %vm1108_vm7 }
 0xad8   :  { %v1103_v48 = vmul.f32 %v1687_v37, %v1102_v38  ;;  %v1100_v39 = vsel %vm1099_vm6, %v1685_v31, %v1096_v9 }
 0xad9   :  { %v1111_v41 = vmul.f32 %v1100_v39, %v1077_v20  ;;  %v1654_v39 = vld [vmem:[%s2266_s19 + $0x1] ss:$0 sm:$0xff] }
 0xada   :  { %v1104_v10 = vmul.f32 0.5, %v1103_v48 }
 0xadb   :  { %v1116_v44 = vmul.f32 %v1649_v12, %v1111_v41 }
 0xadc   :  { %v1105_v40 = vsub.f32 1.5, %v1104_v10 }
 0xadd   :  { %v1121_v50 = vadd.f32 %v1650_v43, %v1116_v44 }
 0xade   :  { %v1106_v15 = vmul.f32 %v1687_v37, %v1105_v40 }
 0xae0   :  { %v1110_v42 = vsel %vm1109_vm9, %v1687_v37, %v1106_v15  ;;  %v1653_v37 = vld [vmem:[%s2265_s18 + $0x1] ss:$0 sm:$0xff] }
 0xae1   :  { %v1112_v45 = vmul.f32 %v1110_v42, %v1078_v18 }
 0xae3   :  { %v1117_v46 = vmul.f32 %v1649_v12, %v1112_v45 }
 0xae5   :  { %v1122_v51 = vadd.f32 %v1650_v43, %v1117_v46 }
 0xae7   :  { %v1128_v52 = vpack.c.bf16 %v1122_v51, %v1121_v50 }
 0xae9   :  { %1563 = vmatmul.msk.bf16.vlgmr.msrb.gmra.mxu1 %vm114_vm0, %v1128_v52 }
 0xb66   :  { %v1158_v57 = vpop.f32.mrf.mxu1 }
 0xb67   :  { %v1159_v59 = vadd.f32 %v1651_v58, %v1158_v57 }
 0xb69   :  { %v1163_v61 = vmax.f32 %v1159_v59, 0.0 }
 0xb6e   :  { %v1160_v3 = vpop.f32.mrf.mxu1 }
 0xb6f   :  { %v1161_v60 = vadd.f32 %v1651_v58, %v1160_v3 }
 0xb71   :  { %v1164_v62 = vmax.f32 %v1161_v60, 0.0  ;;  %v1630_v60 = vld [vmem:[%s2269_s22 + $0x8] sm:$0xff] }
 0xb72   :  { %1367 = vmatpush.bf16.msrb.mxu3 %v1630_v60 }
 0xb73   :  { %v1174_v63 = vpack.c.bf16 %v1164_v62, %v1163_v61 }
 0xb75   :  { %1589 = vmatmul.msk.bf16.vlgmr.msrb.gmra.mxu2 %vm607_vm3, %v1174_v63 }
 0xbf8   :  { %v1216_v1 = vpop.f32.mrf.mxu2 }
 0xbf9   :  { %v1217_v4 = vadd.f32 %v1652_v0, %v1216_v1 }
 0xbfb   :  { %v1221_v5 = vadd.f32 %v1217_v4, %v1121_v50 }
 0xbfd   :  { %v1227_v6 = vsel %vm114_vm0, %v1221_v5, 0.0 }
 0xbfe   :  { %1228 = vadd.xlane.f32.xlu1 %v1227_v6 }
 0xc00   :  { %v1218_v7 = vpop.f32.mrf.mxu2 }
 0xc01   :  { %v1219_v8 = vadd.f32 %v1652_v0, %v1218_v7  ;;  %v1629_v0 = vld [vmem:[%s2269_s22] sm:$0xff] }
 0xc02   :  { %1368 = vmatpush.bf16.msrb.mxu3 %v1629_v0 }
 0xc03   :  { %v1222_v11 = vadd.f32 %v1219_v8, %v1122_v51 }
 0xc05   :  { %v1230_v13 = vsel %vm114_vm0, %v1222_v11, 0.0 }
 0xc06   :  { %1231 = vadd.xlane.f32.xlu2 %v1230_v13 }
 0xc71   :  { %v1229_v16 = vpop.xlane.xlu1 %1228 }
 0xc72   :  { %v1233_v17 = vmul.f32 %v1229_v16, %v2010_v56 }
 0xc74   :  { %v1235_v19 = vsub.f32 %v1221_v5, %v1233_v17 }
 0xc76   :  { %v1237_v20 = vmul.f32 %v1235_v19, %v1235_v19 }
 0xc78   :  { %v1239_v14 = vsel %vm114_vm0, %v1237_v20, 0.0 }
 0xc79   :  { %v1232_v21 = vpop.xlane.xlu2 %1231  ;;  %1240 = vadd.xlane.f32.xlu0 %v1239_v14 }
 0xc7a   :  { %v1234_v23 = vmul.f32 %v1232_v21, %v2010_v56 }
 0xc7c   :  { %v1236_v47 = vsub.f32 %v1222_v11, %v1234_v23 }
 0xc7e   :  { %v1238_v18 = vmul.f32 %v1236_v47, %v1236_v47 }
 0xc80   :  { %v1242_v24 = vsel %vm114_vm0, %v1238_v18, 0.0 }
 0xc81   :  { %1243 = vadd.xlane.f32.xlu1 %v1242_v24 }
 0xcec   :  { %v1241_v25 = vpop.xlane.xlu0 %1240 }
 0xced   :  { %v1245_v49 = vmul.f32 %v1241_v25, %v2010_v56  ;;  %v1656_v25 = vld [vmem:[%s2268_s21] ss:$0 sm:$0xff] }
 0xcef   :  { %v1247_v22 = vadd.f32 1e-05, %v1245_v49 }
 0xcf1   :  { %1688 = vrsqrt.f32 %v1247_v22  ;;  %vm1255_vm10 = vweird.f32 %v1247_v22 }
 0xcf4   :  { %v1244_v26 = vpop.xlane.xlu1 %1243 }
 0xcf5   :  { %v1246_v27 = vmul.f32 %v1244_v26, %v2010_v56 }
 0xcf7   :  { %v1689_v28 = vpop.eup %1688  ;;  %v1248_v29 = vadd.f32 1e-05, %v1246_v27 }
 0xcf8   :  { %v1250_v30 = vmul.f32 %v1689_v28, %v1247_v22  ;;  %vm1256_vm1 = vweird.f32 %v1689_v28 }
 0xcf9   :  { %1690 = vrsqrt.f32 %v1248_v29  ;;  %vm1257_vm11 = vmor %vm1255_vm10, %vm1256_vm1  ;;  %vm1265_vm13 = vweird.f32 %v1248_v29 }
 0xcfa   :  { %v1251_v31 = vmul.f32 %v1689_v28, %v1250_v30  ;;  %v1657_v30 = vld [vmem:[%s2270_s23] ss:$0 sm:$0xff] }
 0xcfc   :  { %v1252_v32 = vmul.f32 0.5, %v1251_v31 }
 0xcfe   :  { %v1253_v33 = vsub.f32 1.5, %v1252_v32 }
 0xcff   :  { %v1691_v34 = vpop.eup %1690 }
 0xd00   :  { %v1254_v35 = vmul.f32 %v1689_v28, %v1253_v33  ;;  %v1260_v36 = vmul.f32 %v1691_v34, %v1248_v29  ;;  %vm1266_vm12 = vweird.f32 %v1691_v34 }
 0xd01   :  { %vm1267_vm14 = vmor %vm1265_vm13, %vm1266_vm12 }
 0xd02   :  { %v1261_v9 = vmul.f32 %v1691_v34, %v1260_v36  ;;  %v1258_v38 = vsel %vm1257_vm11, %v1689_v28, %v1254_v35 }
 0xd03   :  { %v1269_v48 = vmul.f32 %v1258_v38, %v1235_v19 }
 0xd04   :  { %v1262_v10 = vmul.f32 0.5, %v1261_v9 }
 0xd05   :  { %v1274_v40 = vmul.f32 %v1653_v37, %v1269_v48 }
 0xd06   :  { %v1263_v12 = vsub.f32 1.5, %v1262_v10 }
 0xd07   :  { %v1279_v41 = vadd.f32 %v1654_v39, %v1274_v40 }
 0xd08   :  { %v1264_v15 = vmul.f32 %v1691_v34, %v1263_v12 }
 0xd09   :  { %v1283_v42 = vsel %vm114_vm0, %v1279_v41, 0.0 }
 0xd0a   :  { %1284 = vadd.xlane.f32.xlu2 %v1283_v42  ;;  %v1268_v43 = vsel %vm1267_vm14, %v1691_v34, %v1264_v15 }
 0xd0b   :  { %v1270_v44 = vmul.f32 %v1268_v43, %v1236_v47 }
 0xd0d   :  { %v1275_v45 = vmul.f32 %v1653_v37, %v1270_v44 }
 0xd0f   :  { %v1280_v46 = vadd.f32 %v1654_v39, %v1275_v45 }
 0xd11   :  { %v1286_v50 = vsel %vm114_vm0, %v1280_v46, 0.0 }
 0xd12   :  { %1287 = vadd.xlane.f32.xlu0 %v1286_v50 }
 0xd7d   :  { %v1285_v51 = vpop.xlane.xlu2 %1284 }
 0xd7e   :  { %v1289_v52 = vmul.f32 %v1285_v51, %v2010_v56 }
 0xd80   :  { %v1291_v53 = vsub.f32 %v1279_v41, %v1289_v52 }
 0xd82   :  { %v1293_v54 = vmul.f32 %v1291_v53, %v1291_v53 }
 0xd84   :  { %v1295_v55 = vsel %vm114_vm0, %v1293_v54, 0.0 }
 0xd85   :  { %1296 = vadd.xlane.f32.xlu1 %v1295_v55  ;;  %v1288_v2 = vpop.xlane.xlu0 %1287 }
 0xd86   :  { %v1290_v57 = vmul.f32 %v1288_v2, %v2010_v56 }
 0xd88   :  { %v1292_v58 = vsub.f32 %v1280_v46, %v1290_v57 }
 0xd8a   :  { %v1294_v59 = vmul.f32 %v1292_v58, %v1292_v58 }
 0xd8c   :  { %v1298_v3 = vsel %vm114_vm0, %v1294_v59, 0.0 }
 0xd8d   :  { %1299 = vadd.xlane.f32.xlu2 %v1298_v3 }
 0xdf8   :  { %v1297_v61 = vpop.xlane.xlu1 %1296 }
 0xdf9   :  { %v1301_v62 = vmul.f32 %v1297_v61, %v2010_v56 }
 0xdfb   :  { %v1303_v63 = vadd.f32 1e-05, %v1301_v62 }
 0xdfd   :  { %1692 = vrsqrt.f32 %v1303_v63  ;;  %vm1311_vm2 = vweird.f32 %v1303_v63 }
 0xe00   :  { %v1300_v1 = vpop.xlane.xlu2 %1299 }
 0xe01   :  { %v1302_v4 = vmul.f32 %v1300_v1, %v2010_v56  ;;  %v1655_v56 = vld [vmem:[%s2267_s20] ss:$0 sm:$0xff]  ;;  %s1723_s20 = smov [#allocation2]  }
 0xe02   :  { %s1381_s0 = sshll.u32 %s1723_s20, 4  ;;  %s1382_s0 = int_to_ptr.vmem [resolvable:$true] %s1381_s0 }
 0xe03   :  { %v1693_v5 = vpop.eup %1692  ;;  %v1304_v6 = vadd.f32 1e-05, %v1302_v4 }
 0xe04   :  { %v1306_v7 = vmul.f32 %v1693_v5, %v1303_v63  ;;  %vm1312_vm15 = vweird.f32 %v1693_v5 }
 0xe05   :  { %1694 = vrsqrt.f32 %v1304_v6  ;;  %vm1313_vm4 = vmor %vm1311_vm2, %vm1312_vm15  ;;  %vm1321_vm6 = vweird.f32 %v1304_v6 }
 0xe06   :  { %v1307_v8 = vmul.f32 %v1693_v5, %v1306_v7 }
 0xe08   :  { %v1308_v11 = vmul.f32 0.5, %v1307_v8 }
 0xe0a   :  { %v1309_v13 = vsub.f32 1.5, %v1308_v11 }
 0xe0b   :  { %v1695_v16 = vpop.eup %1694 }
 0xe0c   :  { %v1310_v17 = vmul.f32 %v1693_v5, %v1309_v13  ;;  %v1316_v19 = vmul.f32 %v1695_v16, %v1304_v6  ;;  %vm1322_vm5 = vweird.f32 %v1695_v16 }
 0xe0d   :  { %vm1323_vm7 = vmor %vm1321_vm6, %vm1322_vm5 }
 0xe0e   :  { %v1317_v20 = vmul.f32 %v1695_v16, %v1316_v19  ;;  %v1314_v14 = vsel %vm1313_vm4, %v1693_v5, %v1310_v17 }
 0xe0f   :  { %v1325_v47 = vmul.f32 %v1314_v14, %v1291_v53 }
 0xe10   :  { %v1318_v21 = vmul.f32 0.5, %v1317_v20 }
 0xe11   :  { %v1330_v49 = vmul.f32 %v1655_v56, %v1325_v47 }
 0xe12   :  { %v1319_v23 = vsub.f32 1.5, %v1318_v21 }
 0xe13   :  { %v1335_v27 = vadd.f32 %v1656_v25, %v1330_v49 }
 0xe14   :  { %v1320_v18 = vmul.f32 %v1695_v16, %v1319_v23 }
 0xe16   :  { %v1324_v24 = vsel %vm1323_vm7, %v1695_v16, %v1320_v18 }
 0xe17   :  { %v1326_v22 = vmul.f32 %v1324_v24, %v1292_v58 }
 0xe19   :  { %v1331_v26 = vmul.f32 %v1655_v56, %v1326_v22 }
 0xe1b   :  { %v1336_v28 = vadd.f32 %v1656_v25, %v1331_v26 }
 0xe1d   :  { %v1341_v29 = vpack.c.bf16 %v1336_v28, %v1335_v27 }
 0xe1f   :  { %1600 = vmatmul.msk.bf16.vlgmr.msrb.gmra.mxu3 %vm114_vm0, %v1341_v29 }
 0xea2   :  { %v1370_v31 = vpop.f32.mrf.mxu3 }
 0xea3   :  { %v1371_v32 = vadd.f32 %v1657_v30, %v1370_v31 }
 0xea5   :  { %1375 = vst.msk [vmem:[#allocation2] sm:$0xff] %vm607_vm3, %v1371_v32 }
 0xeaa   :  { %v1372_v33 = vpop.f32.mrf.mxu3 }
 0xeab   :  { %v1373_v34 = vadd.f32 %v1657_v30, %v1372_v33 }
 0xead   :  { %1376 = vst.msk [vmem:[#allocation2 + $0x8] sm:$0xff] %vm607_vm3, %v1373_v34 }
 0xeae   :  { %1389 = dma.vmem_to_hbm [thread:$0]  %s1382_s0, 256, %s1384_s2, [#allocation3], %s1724_s12, %s1724_s12, %s1725_s27  }
 0xeaf   :  { %1720 = dma.done.wait [#allocation3], 256  }
 0xeb0   :  { %1721 = vsyncadd [#allocation3], 4294967040 }
 0xeb1   :  { %1398 = vsyncpa [#allocation3], 1 }

</bundles_post_ra>
